<compile_context>
chip_gen: v6e
topology: v6e:2x2x1
jax: 0.10.0
libtpu: 0.0.40
codegen_flags: <defaults>
</compile_context>

<pallas_src>
import functools

import jax
import jax.numpy as jnp
from jax import lax
from jax.experimental import pallas as pl
from jax.experimental.pallas import tpu as pltpu

EPS = 1e-5  # PyTorch nn.LayerNorm default eps
_SQRT_HALF = 0.7071067811865476


# ----------------------------- small helpers -----------------------------

def _detect_pipeline_mode():
    try:
        pl.BlockSpec((8, 128), lambda i, j: (0, 0), pipeline_mode=pl.Buffered(1))
        return True
    except Exception:
        return False


_HAS_PIPELINE_MODE = _detect_pipeline_mode()
_single_buffer_ok = _HAS_PIPELINE_MODE  # flipped off once if Buffered(1) fails to lower


@functools.lru_cache(maxsize=1)
def _vmem_limit_bytes():
    cap = 64 * 1024 * 1024  # conservative fallback (v7x physical VMEM per TC)
    try:
        cap = int(pltpu.get_tpu_info().vmem_capacity_bytes)
    except Exception:
        pass
    return int(cap * 0.85)  # leave headroom for the runtime


def _layernorm_f32(x, gamma, beta):
    # x: (N, D) f32, gamma/beta: (1, D) f32
    mu = jnp.mean(x, axis=-1, keepdims=True)
    var = jnp.mean(jnp.square(x - mu), axis=-1, keepdims=True)
    return (x - mu) * lax.rsqrt(var + EPS) * gamma + beta


def _pick_seq_tile(n, heads, vmem_budget):
    """Largest query tile dividing N whose f32 (heads, TQ, N) score block plus
    its exp temporary fits in ~1/4 of the VMEM budget (weights, K/V scratch and
    activations get the rest)."""
    score_budget = max(vmem_budget // 4, 2 << 20)
    cap = max(8, score_budget // max(1, heads * n * 4 * 2))
    for t in (1024, 512, 256, 128, 64, 32, 16, 8):
        if t <= cap and n % t == 0:
            return t
    return n  # tiny / odd sequence lengths: single tile


# ----------------------------- fused transformer layer -----------------------------

def layer_kernel(x_f_ref, g_ref, b_ref,
                 wq_ref, wk_ref, wv_ref, wo_ref, bo_ref,
                 w1_ref, b1_ref, w2_ref, b2_ref,
                 *rest, heads, dim_head, apply_final_ln):
    if apply_final_ln:
        fg_ref, fb_ref, o_ref, k_scr, v_scr = rest
    else:
        o_ref, k_scr, v_scr = rest

    f32 = jnp.float32
    bf16 = jnp.bfloat16
    tq = o_ref.shape[1]
    n = x_f_ref.shape[1]
    inner = heads * dim_head

    g = g_ref[...]  # (1, D)
    b = b_ref[...]  # (1, D)

    # ---- K/V (and their LayerNorm) once per batch item, reused by all query tiles ----
    @pl.when(pl.program_id(1) == 0)
    def _():
        xf = x_f_ref[0].astype(f32)                                   # (N, D)
        xf_n = _layernorm_f32(xf, g, b).astype(bf16)
        k = jnp.dot(xf_n, wk_ref[...], preferred_element_type=f32)    # (N, inner)
        v = jnp.dot(xf_n, wv_ref[...], preferred_element_type=f32)
        k_scr[...] = k.reshape(n, heads, dim_head).transpose(1, 0, 2).astype(bf16)
        v_scr[...] = v.reshape(n, heads, dim_head).transpose(1, 0, 2).astype(bf16)

    # ---- query tile: sliced out of the already-resident full-sequence block ----
    q_start = pl.multiple_of(pl.program_id(1) * tq, tq)
    xq = x_f_ref[0, pl.ds(q_start, tq), :].astype(f32)                # (TQ, D)
    xq_n = _layernorm_f32(xq, g, b)

    # 1/sqrt(dim_head) is folded into wq at init.
    q = jnp.dot(xq_n.astype(bf16), wq_ref[...], preferred_element_type=f32)  # (TQ, inner)
    qh = q.reshape(tq, heads, dim_head).transpose(1, 0, 2).astype(bf16)      # (h, TQ, dh)

    # All heads in one batched contraction.
    s = jnp.einsum('hqd,hkd->hqk', qh, k_scr[...],
                   preferred_element_type=f32)                        # (h, TQ, N)
    s = s - jnp.max(s, axis=-1, keepdims=True)                        # stable softmax
    e = jnp.exp(s)
    denom = jnp.sum(e, axis=-1, keepdims=True)                        # (h, TQ, 1)
    ctx = jnp.einsum('hqk,hkd->hqd', e.astype(bf16), v_scr[...],
                     preferred_element_type=f32)                      # (h, TQ, dh)
    ctx = ctx * pl.reciprocal(denom, approx=True)                     # normalize post-PV
    ctx = ctx.transpose(1, 0, 2).reshape(tq, inner)                   # (TQ, inner)

    attn = jnp.dot(ctx.astype(bf16), wo_ref[...],
                   preferred_element_type=f32) + bo_ref[...]          # (TQ, D)
    x1 = attn + xq                                                    # residual 1

    # ---- FeedForward ----
    h = jnp.dot(x1.astype(bf16), w1_ref[...],
                preferred_element_type=f32) + b1_ref[...]             # (TQ, H)
    h = 0.5 * h * (1.0 + lax.erf(h * _SQRT_HALF))                     # exact GELU (erf)
    y = jnp.dot(h.astype(bf16), w2_ref[...],
                preferred_element_type=f32) + b2_ref[...]             # (TQ, D)
    x2 = y + x1                                                       # residual 2

    # ---- fused final LayerNorm on the last layer ----
    if apply_final_ln:
        x2 = _layernorm_f32(x2, fg_ref[...], fb_ref[...])

    o_ref[0] = x2.astype(o_ref.dtype)


def run_layer(x, lyr, final_gamma, final_beta, *, heads, dim_head, apply_final_ln):
    global _single_buffer_ok
    B, N, D = x.shape
    inner = heads * dim_head
    H = lyr["w1"].shape[1]
    vmem_budget = _vmem_limit_bytes()
    TQ = _pick_seq_tile(N, heads, vmem_budget)
    nq = N // TQ

    kern = functools.partial(layer_kernel, heads=heads, dim_head=dim_head,
                             apply_final_ln=apply_final_ln)

    def build(single_buffer_weights):
        def wspec(shape):
            idx = lambda bi, qi: (0,) * len(shape)
            if single_buffer_weights:
                # Constant index_map => double-buffering buys nothing; single-buffer.
                return pl.BlockSpec(shape, idx, pipeline_mode=pl.Buffered(1))
            return pl.BlockSpec(shape, idx)

        in_specs = [
            pl.BlockSpec((1, N, D), lambda bi, qi: (bi, 0, 0)),       # full sequence
            wspec((1, D)), wspec((1, D)),                             # attn LN gamma/beta
            wspec((D, inner)), wspec((D, inner)), wspec((D, inner)),  # wq, wk, wv
            wspec((inner, D)), wspec((1, D)),                         # wo, bo
            wspec((D, H)), wspec((1, H)), wspec((H, D)), wspec((1, D)),  # w1,b1,w2,b2
        ]
        if apply_final_ln:
            in_specs += [wspec((1, D)), wspec((1, D))]

        return pl.pallas_call(
            kern,
            out_shape=jax.ShapeDtypeStruct((B, N, D), x.dtype),
            grid=(B, nq),
            in_specs=in_specs,
            out_specs=pl.BlockSpec((1, TQ, D), lambda bi, qi: (bi, qi, 0)),
            scratch_shapes=[
                pltpu.VMEM((heads, N, dim_head), jnp.bfloat16),       # K (head-major)
                pltpu.VMEM((heads, N, dim_head), jnp.bfloat16),       # V (head-major)
            ],
            compiler_params=pltpu.CompilerParams(
                # bi "parallel" (megacore shards over batch); qi must be
                # "arbitrary" because the K/V scratch carries across query tiles.
                dimension_semantics=("parallel", "arbitrary"),
                vmem_limit_bytes=vmem_budget),
        )

    args = [x, lyr["ln_gamma"], lyr["ln_beta"],
            lyr["wq"], lyr["wk"], lyr["wv"], lyr["wo"], lyr["bo"],
            lyr["w1"], lyr["b1"], lyr["w2"], lyr["b2"]]
    if apply_final_ln:
        args += [final_gamma, final_beta]

    if _single_buffer_ok:
        try:
            return build(True)(*args)
        except Exception:
            _single_buffer_ok = False  # this JAX/Mosaic rejects Buffered(1); fall back
    return build(False)(*args)


# ----------------------------- full Transformer -----------------------------

def init_params(key, dim, depth, heads, dim_head, mlp_dim):
    inner = heads * dim_head
    scale = dim_head ** -0.5
    bf16 = jnp.bfloat16
    params = {"layers": [],
              "final_gamma": jnp.ones((1, dim), jnp.float32),
              "final_beta": jnp.zeros((1, dim), jnp.float32)}
    for _ in range(depth):
        key, kq, kk, kv, ko, k1, k2 = jax.random.split(key, 7)
        layer = {
            "ln_gamma": jnp.ones((1, dim), jnp.float32),
            "ln_beta": jnp.zeros((1, dim), jnp.float32),
            # MXU operands stored as bf16 (halves weight DMA / VMEM footprint).
            # The 1/sqrt(dim_head) attention scale is folded into wq here, so
            # neither the kernel nor the reference applies it again.
            "wq": (0.02 * scale *
                   jax.random.normal(kq, (dim, inner), jnp.float32)).astype(bf16),
            "wk": (0.02 * jax.random.normal(kk, (dim, inner), jnp.float32)).astype(bf16),
            "wv": (0.02 * jax.random.normal(kv, (dim, inner), jnp.float32)).astype(bf16),
            "wo": (0.02 * jax.random.normal(ko, (inner, dim), jnp.float32)).astype(bf16),
            "bo": jnp.zeros((1, dim), jnp.float32),
            "w1": (0.02 * jax.random.normal(k1, (dim, mlp_dim), jnp.float32)).astype(bf16),
            "b1": jnp.zeros((1, mlp_dim), jnp.float32),
            "w2": (0.02 * jax.random.normal(k2, (mlp_dim, dim), jnp.float32)).astype(bf16),
            "b2": jnp.zeros((1, dim), jnp.float32),
        }
        params["layers"].append(layer)
    return params


def transformer_pallas(x, params, *, heads, dim_head):
    n_layers = len(params["layers"])
    assert n_layers >= 1
    for i, lyr in enumerate(params["layers"]):
        x = run_layer(x, lyr, params["final_gamma"], params["final_beta"],
                      heads=heads, dim_head=dim_head,
                      apply_final_ln=(i == n_layers - 1))
    return x


# pure-JAX reference (f32 math, same parameter values) for a sanity check
def transformer_ref(x, params, *, heads, dim_head):
    def ln(v, g, b):
        mu = jnp.mean(v, -1, keepdims=True)
        var = jnp.mean((v - mu) ** 2, -1, keepdims=True)
        return (v - mu) / jnp.sqrt(var + EPS) * g + b

    inner = heads * dim_head
    B, N, _ = x.shape
    for lyr in params["layers"]:
        # NOTE: wq already carries the 1/sqrt(dim_head) factor (folded at init),
        # so the dots are NOT rescaled here — matches the kernel and the module.
        wq = lyr["wq"].astype(jnp.float32)
        wk = lyr["wk"].astype(jnp.float32)
        wv = lyr["wv"].astype(jnp.float32)
        wo = lyr["wo"].astype(jnp.float32)
        w1 = lyr["w1"].astype(jnp.float32)
        w2 = lyr["w2"].astype(jnp.float32)

        xn = ln(x, lyr["ln_gamma"], lyr["ln_beta"])
        q, k, v = xn @ wq, xn @ wk, xn @ wv

        def split(t):
            return t.reshape(B, N, heads, dim_head).transpose(0, 2, 1, 3)
        qh, kh, vh = map(split, (q, k, v))
        dots = jnp.einsum("bhnd,bhmd->bhnm", qh, kh)
        attn = jax.nn.softmax(dots, axis=-1)
        out = jnp.einsum("bhnm,bhmd->bhnd", attn, vh)
        out = out.transpose(0, 2, 1, 3).reshape(B, N, inner)
        x = out @ wo + lyr["bo"] + x

        h = x @ w1 + lyr["b1"]
        h = 0.5 * h * (1.0 + lax.erf(h * _SQRT_HALF))
        x = h @ w2 + lyr["b2"] + x
    return ln(x, params["final_gamma"], params["final_beta"])


if __name__ == "__main__":
    # Toy shapes for the correctness check only.  For performance measurements
    # use representative sizes (D >= 512, N >= 1024, dim_head in {64, 128}).
    B, N = 2, 8
    dim, depth, heads, dim_head, mlp_dim = 32, 2, 4, 8, 64

    key = jax.random.PRNGKey(0)
    kx, kp = jax.random.split(key)
    x = jax.random.normal(kx, (B, N, dim), jnp.float32)
    params = init_params(kp, dim, depth, heads, dim_head, mlp_dim)

    out = transformer_pallas(x, params, heads=heads, dim_head=dim_head)
    out = jax.block_until_ready(out)

    ref = transformer_ref(x, params, heads=heads, dim_head=dim_head)
    assert out.shape == (B, N, dim)
    # bf16 MXU operands + approx reciprocal in the kernel => looser tolerance vs f32 ref.
    assert jnp.allclose(out, ref, atol=2e-2, rtol=2e-2), "mismatch vs reference"

    print("KERNEL_OK")
</pallas_src>

<mosaic_0001>
module attributes {stable_mosaic.version = 11 : i64} {
  func.func @layer_kernel(%arg0: i32, %arg1: i32, %arg2: memref<1x8x32xf32, #tpu.memory_space<vmem>>, %arg3: memref<1x32xf32, #tpu.memory_space<vmem>>, %arg4: memref<1x32xf32, #tpu.memory_space<vmem>>, %arg5: memref<32x32xbf16, #tpu.memory_space<vmem>>, %arg6: memref<32x32xbf16, #tpu.memory_space<vmem>>, %arg7: memref<32x32xbf16, #tpu.memory_space<vmem>>, %arg8: memref<32x32xbf16, #tpu.memory_space<vmem>>, %arg9: memref<1x32xf32, #tpu.memory_space<vmem>>, %arg10: memref<32x64xbf16, #tpu.memory_space<vmem>>, %arg11: memref<1x64xf32, #tpu.memory_space<vmem>>, %arg12: memref<64x32xbf16, #tpu.memory_space<vmem>>, %arg13: memref<1x32xf32, #tpu.memory_space<vmem>>, %arg14: memref<1x8x32xf32, #tpu.memory_space<vmem>>, %arg15: memref<4x8x8xbf16, #tpu.memory_space<vmem>>, %arg16: memref<4x8x8xbf16, #tpu.memory_space<vmem>>) attributes {dimension_semantics = [#tpu.dimension_semantics<parallel>, #tpu.dimension_semantics<arbitrary>], iteration_bounds = array<i64: 2, 1>, scalar_prefetch = 0 : i64, scratch_operands = 2 : i64, tpu.core_type = #tpu.core_type<tc>, window_params = [{transform_indices = @transform_0, window_bounds = array<i64: 1, 8, 32>}, {pipeline_mode = #tpu.pipeline_mode<synchronous>, transform_indices = @transform_1, window_bounds = array<i64: 1, 32>}, {pipeline_mode = #tpu.pipeline_mode<synchronous>, transform_indices = @transform_2, window_bounds = array<i64: 1, 32>}, {pipeline_mode = #tpu.pipeline_mode<synchronous>, transform_indices = @transform_3, window_bounds = array<i64: 32, 32>}, {pipeline_mode = #tpu.pipeline_mode<synchronous>, transform_indices = @transform_4, window_bounds = array<i64: 32, 32>}, {pipeline_mode = #tpu.pipeline_mode<synchronous>, transform_indices = @transform_5, window_bounds = array<i64: 32, 32>}, {pipeline_mode = #tpu.pipeline_mode<synchronous>, transform_indices = @transform_6, window_bounds = array<i64: 32, 32>}, {pipeline_mode = #tpu.pipeline_mode<synchronous>, transform_indices = @transform_7, window_bounds = array<i64: 1, 32>}, {pipeline_mode = #tpu.pipeline_mode<synchronous>, transform_indices = @transform_8, window_bounds = array<i64: 32, 64>}, {pipeline_mode = #tpu.pipeline_mode<synchronous>, transform_indices = @transform_9, window_bounds = array<i64: 1, 64>}, {pipeline_mode = #tpu.pipeline_mode<synchronous>, transform_indices = @transform_10, window_bounds = array<i64: 64, 32>}, {pipeline_mode = #tpu.pipeline_mode<synchronous>, transform_indices = @transform_11, window_bounds = array<i64: 1, 32>}, {transform_indices = @transform_12, window_bounds = array<i64: 1, 8, 32>}]} {
    %c0 = arith.constant 0 : index
    %c0_0 = arith.constant 0 : index
    %0 = vector.load %arg3[%c0, %c0_0] : memref<1x32xf32, #tpu.memory_space<vmem>>, vector<1x32xf32>
    %c0_1 = arith.constant 0 : index
    %c0_2 = arith.constant 0 : index
    %1 = vector.load %arg4[%c0_1, %c0_2] : memref<1x32xf32, #tpu.memory_space<vmem>>, vector<1x32xf32>
    %c0_i32 = arith.constant 0 : i32
    %2 = arith.cmpi eq, %arg1, %c0_i32 : i32
    %3 = arith.extui %2 : i1 to i32
    %c0_i32_3 = arith.constant 0 : i32
    %4 = arith.cmpi ne, %3, %c0_i32_3 : i32
    scf.if %4 {
      %c0_44 = arith.constant 0 : index
      %c0_45 = arith.constant 0 : index
      %c0_46 = arith.constant 0 : index
      %86 = vector.load %arg2[%c0_44, %c0_45, %c0_46] : memref<1x8x32xf32, #tpu.memory_space<vmem>>, vector<1x8x32xf32>
      %87 = vector.shape_cast %86 : vector<1x8x32xf32> to vector<8x32xf32>
      %cst_47 = arith.constant dense<0.000000e+00> : vector<8xf32>
      %88 = vector.multi_reduction <add>, %87, %cst_47 [1] : vector<8x32xf32> to vector<8xf32>
      %89 = vector.shape_cast %88 : vector<8xf32> to vector<8x1xf32>
      %cst_48 = arith.constant 3.200000e+01 : f32
      %90 = vector.broadcast %cst_48 : f32 to vector<8x1xf32>
      %91 = arith.divf %89, %90 : vector<8x1xf32>
      %92 = vector.broadcast %91 : vector<8x1xf32> to vector<8x32xf32>
      %93 = arith.subf %87, %92 : vector<8x32xf32>
      %94 = arith.mulf %93, %93 : vector<8x32xf32>
      %cst_49 = arith.constant dense<0.000000e+00> : vector<8xf32>
      %95 = vector.multi_reduction <add>, %94, %cst_49 [1] : vector<8x32xf32> to vector<8xf32>
      %96 = vector.shape_cast %95 : vector<8xf32> to vector<8x1xf32>
      %cst_50 = arith.constant 3.200000e+01 : f32
      %97 = vector.broadcast %cst_50 : f32 to vector<8x1xf32>
      %98 = arith.divf %96, %97 : vector<8x1xf32>
      %99 = vector.broadcast %91 : vector<8x1xf32> to vector<8x32xf32>
      %100 = arith.subf %87, %99 : vector<8x32xf32>
      %cst_51 = arith.constant 9.99999974E-6 : f32
      %101 = vector.broadcast %cst_51 : f32 to vector<8x1xf32>
      %102 = arith.addf %98, %101 : vector<8x1xf32>
      %103 = math.rsqrt %102 : vector<8x1xf32>
      %104 = vector.broadcast %103 : vector<8x1xf32> to vector<8x32xf32>
      %105 = arith.mulf %100, %104 : vector<8x32xf32>
      %106 = vector.broadcast %0 : vector<1x32xf32> to vector<8x32xf32>
      %107 = arith.mulf %105, %106 : vector<8x32xf32>
      %108 = vector.broadcast %1 : vector<1x32xf32> to vector<8x32xf32>
      %109 = arith.addf %107, %108 : vector<8x32xf32>
      %110 = arith.truncf %109 : vector<8x32xf32> to vector<8x32xbf16>
      %c0_52 = arith.constant 0 : index
      %c0_53 = arith.constant 0 : index
      %111 = vector.load %arg6[%c0_52, %c0_53] : memref<32x32xbf16, #tpu.memory_space<vmem>>, vector<32x32xbf16>
      %cst_54 = arith.constant dense<0.000000e+00> : vector<8x32xf32>
      %112 = tpu.matmul %110, %111, %cst_54 {dimension_numbers = #tpu.dot_dimension_numbers<[1], [0], [0], [1], [0, 0, 1, 1], [], []>} : vector<8x32xbf16>, vector<32x32xbf16>, vector<8x32xf32> -> vector<8x32xf32>
      %c0_55 = arith.constant 0 : index
      %c0_56 = arith.constant 0 : index
      %113 = vector.load %arg7[%c0_55, %c0_56] : memref<32x32xbf16, #tpu.memory_space<vmem>>, vector<32x32xbf16>
      %cst_57 = arith.constant dense<0.000000e+00> : vector<8x32xf32>
      %114 = tpu.matmul %110, %113, %cst_57 {dimension_numbers = #tpu.dot_dimension_numbers<[1], [0], [0], [1], [0, 0, 1, 1], [], []>} : vector<8x32xbf16>, vector<32x32xbf16>, vector<8x32xf32> -> vector<8x32xf32>
      %115 = vector.shape_cast %112 : vector<8x32xf32> to vector<8x4x8xf32>
      %116 = tpu.transpose %115, [1, 0, 2] : vector<8x4x8xf32> -> vector<4x8x8xf32>
      %117 = arith.truncf %116 : vector<4x8x8xf32> to vector<4x8x8xbf16>
      %c0_58 = arith.constant 0 : index
      %c0_59 = arith.constant 0 : index
      %c0_60 = arith.constant 0 : index
      %118 = vector.load %arg15[%c0_58, %c0_59, %c0_60] : memref<4x8x8xbf16, #tpu.memory_space<vmem>>, vector<4x8x8xbf16>
      tpu.vector_store %arg15[%c0_58, %c0_59, %c0_60], %117 {strides = array<i32>} : memref<4x8x8xbf16, #tpu.memory_space<vmem>>, vector<4x8x8xbf16>,
      %119 = vector.shape_cast %114 : vector<8x32xf32> to vector<8x4x8xf32>
      %120 = tpu.transpose %119, [1, 0, 2] : vector<8x4x8xf32> -> vector<4x8x8xf32>
      %121 = arith.truncf %120 : vector<4x8x8xf32> to vector<4x8x8xbf16>
      %c0_61 = arith.constant 0 : index
      %c0_62 = arith.constant 0 : index
      %c0_63 = arith.constant 0 : index
      %122 = vector.load %arg16[%c0_61, %c0_62, %c0_63] : memref<4x8x8xbf16, #tpu.memory_space<vmem>>, vector<4x8x8xbf16>
      tpu.vector_store %arg16[%c0_61, %c0_62, %c0_63], %121 {strides = array<i32>} : memref<4x8x8xbf16, #tpu.memory_space<vmem>>, vector<4x8x8xbf16>,
    } else {
    }
    %c8_i32 = arith.constant 8 : i32
    %5 = arith.muli %arg1, %c8_i32 : i32
    %6 = tpu.assume_multiple %5, 8 : i32
    %c0_4 = arith.constant 0 : index
    %7 = arith.index_cast %6 : i32 to index
    %c0_5 = arith.constant 0 : index
    %8 = vector.load %arg2[%c0_4, %7, %c0_5] : memref<1x8x32xf32, #tpu.memory_space<vmem>>, vector<1x8x32xf32>
    %9 = vector.shape_cast %8 : vector<1x8x32xf32> to vector<8x32xf32>
    %cst = arith.constant dense<0.000000e+00> : vector<8xf32>
    %10 = vector.multi_reduction <add>, %9, %cst [1] : vector<8x32xf32> to vector<8xf32>
    %11 = vector.shape_cast %10 : vector<8xf32> to vector<8x1xf32>
    %cst_6 = arith.constant 3.200000e+01 : f32
    %12 = vector.broadcast %cst_6 : f32 to vector<8x1xf32>
    %13 = arith.divf %11, %12 : vector<8x1xf32>
    %14 = vector.broadcast %13 : vector<8x1xf32> to vector<8x32xf32>
    %15 = arith.subf %9, %14 : vector<8x32xf32>
    %16 = arith.mulf %15, %15 : vector<8x32xf32>
    %cst_7 = arith.constant dense<0.000000e+00> : vector<8xf32>
    %17 = vector.multi_reduction <add>, %16, %cst_7 [1] : vector<8x32xf32> to vector<8xf32>
    %18 = vector.shape_cast %17 : vector<8xf32> to vector<8x1xf32>
    %cst_8 = arith.constant 3.200000e+01 : f32
    %19 = vector.broadcast %cst_8 : f32 to vector<8x1xf32>
    %20 = arith.divf %18, %19 : vector<8x1xf32>
    %21 = vector.broadcast %13 : vector<8x1xf32> to vector<8x32xf32>
    %22 = arith.subf %9, %21 : vector<8x32xf32>
    %cst_9 = arith.constant 9.99999974E-6 : f32
    %23 = vector.broadcast %cst_9 : f32 to vector<8x1xf32>
    %24 = arith.addf %20, %23 : vector<8x1xf32>
    %25 = math.rsqrt %24 : vector<8x1xf32>
    %26 = vector.broadcast %25 : vector<8x1xf32> to vector<8x32xf32>
    %27 = arith.mulf %22, %26 : vector<8x32xf32>
    %28 = vector.broadcast %0 : vector<1x32xf32> to vector<8x32xf32>
    %29 = arith.mulf %27, %28 : vector<8x32xf32>
    %30 = vector.broadcast %1 : vector<1x32xf32> to vector<8x32xf32>
    %31 = arith.addf %29, %30 : vector<8x32xf32>
    %32 = arith.truncf %31 : vector<8x32xf32> to vector<8x32xbf16>
    %c0_10 = arith.constant 0 : index
    %c0_11 = arith.constant 0 : index
    %33 = vector.load %arg5[%c0_10, %c0_11] : memref<32x32xbf16, #tpu.memory_space<vmem>>, vector<32x32xbf16>
    %cst_12 = arith.constant dense<0.000000e+00> : vector<8x32xf32>
    %34 = tpu.matmul %32, %33, %cst_12 {dimension_numbers = #tpu.dot_dimension_numbers<[1], [0], [0], [1], [0, 0, 1, 1], [], []>} : vector<8x32xbf16>, vector<32x32xbf16>, vector<8x32xf32> -> vector<8x32xf32>
    %35 = vector.shape_cast %34 : vector<8x32xf32> to vector<8x4x8xf32>
    %36 = tpu.transpose %35, [1, 0, 2] : vector<8x4x8xf32> -> vector<4x8x8xf32>
    %37 = arith.truncf %36 : vector<4x8x8xf32> to vector<4x8x8xbf16>
    %c0_13 = arith.constant 0 : index
    %c0_14 = arith.constant 0 : index
    %c0_15 = arith.constant 0 : index
    %38 = vector.load %arg15[%c0_13, %c0_14, %c0_15] : memref<4x8x8xbf16, #tpu.memory_space<vmem>>, vector<4x8x8xbf16>
    "tpu.trace_start"() <{level = 10 : i32, message = "hqd,hkd->hqk"}> : () -> ()
    %cst_16 = arith.constant dense<0.000000e+00> : vector<4x8x8xf32>
    %39 = tpu.matmul %37, %38, %cst_16 {dimension_numbers = #tpu.dot_dimension_numbers<[2], [2], [1], [1], [0, 0, 0, 1, 1, 1], [0], [0]>} : vector<4x8x8xbf16>, vector<4x8x8xbf16>, vector<4x8x8xf32> -> vector<4x8x8xf32>
    "tpu.trace_stop"() : () -> ()
    %cst_17 = arith.constant dense<0xFF800000> : vector<4x8xf32>
    %40 = vector.multi_reduction <maximumf>, %39, %cst_17 [2] : vector<4x8x8xf32> to vector<4x8xf32>
    %41 = vector.shape_cast %40 : vector<4x8xf32> to vector<4x8x1xf32>
    %42 = vector.broadcast %41 : vector<4x8x1xf32> to vector<4x8x8xf32>
    %43 = arith.subf %39, %42 : vector<4x8x8xf32>
    %44 = math.exp %43 : vector<4x8x8xf32>
    %cst_18 = arith.constant dense<0.000000e+00> : vector<4x8xf32>
    %45 = vector.multi_reduction <add>, %44, %cst_18 [2] : vector<4x8x8xf32> to vector<4x8xf32>
    %46 = vector.shape_cast %45 : vector<4x8xf32> to vector<4x8x1xf32>
    %47 = arith.truncf %44 : vector<4x8x8xf32> to vector<4x8x8xbf16>
    %c0_19 = arith.constant 0 : index
    %c0_20 = arith.constant 0 : index
    %c0_21 = arith.constant 0 : index
    %48 = vector.load %arg16[%c0_19, %c0_20, %c0_21] : memref<4x8x8xbf16, #tpu.memory_space<vmem>>, vector<4x8x8xbf16>
    "tpu.trace_start"() <{level = 10 : i32, message = "hqk,hkd->hqd"}> : () -> ()
    %cst_22 = arith.constant dense<0.000000e+00> : vector<4x8x8xf32>
    %49 = tpu.matmul %47, %48, %cst_22 {dimension_numbers = #tpu.dot_dimension_numbers<[2], [1], [1], [2], [0, 0, 0, 1, 1, 2], [0], [0]>} : vector<4x8x8xbf16>, vector<4x8x8xbf16>, vector<4x8x8xf32> -> vector<4x8x8xf32>
    "tpu.trace_stop"() : () -> ()
    %50 = tpu.reciprocal %46 {approx = true} : vector<4x8x1xf32> -> vector<4x8x1xf32>
    %51 = vector.broadcast %50 : vector<4x8x1xf32> to vector<4x8x8xf32>
    %52 = arith.mulf %49, %51 : vector<4x8x8xf32>
    %53 = tpu.transpose %52, [1, 0, 2] : vector<4x8x8xf32> -> vector<8x4x8xf32>
    %54 = vector.shape_cast %53 : vector<8x4x8xf32> to vector<8x32xf32>
    %55 = arith.truncf %54 : vector<8x32xf32> to vector<8x32xbf16>
    %c0_23 = arith.constant 0 : index
    %c0_24 = arith.constant 0 : index
    %56 = vector.load %arg8[%c0_23, %c0_24] : memref<32x32xbf16, #tpu.memory_space<vmem>>, vector<32x32xbf16>
    %cst_25 = arith.constant dense<0.000000e+00> : vector<8x32xf32>
    %57 = tpu.matmul %55, %56, %cst_25 {dimension_numbers = #tpu.dot_dimension_numbers<[1], [0], [0], [1], [0, 0, 1, 1], [], []>} : vector<8x32xbf16>, vector<32x32xbf16>, vector<8x32xf32> -> vector<8x32xf32>
    %c0_26 = arith.constant 0 : index
    %c0_27 = arith.constant 0 : index
    %58 = vector.load %arg9[%c0_26, %c0_27] : memref<1x32xf32, #tpu.memory_space<vmem>>, vector<1x32xf32>
    %59 = vector.broadcast %58 : vector<1x32xf32> to vector<8x32xf32>
    %60 = arith.addf %57, %59 : vector<8x32xf32>
    %61 = arith.addf %60, %9 : vector<8x32xf32>
    %62 = arith.truncf %61 : vector<8x32xf32> to vector<8x32xbf16>
    %c0_28 = arith.constant 0 : index
    %c0_29 = arith.constant 0 : index
    %63 = vector.load %arg10[%c0_28, %c0_29] : memref<32x64xbf16, #tpu.memory_space<vmem>>, vector<32x64xbf16>
    %cst_30 = arith.constant dense<0.000000e+00> : vector<8x64xf32>
    %64 = tpu.matmul %62, %63, %cst_30 {dimension_numbers = #tpu.dot_dimension_numbers<[1], [0], [0], [1], [0, 0, 1, 1], [], []>} : vector<8x32xbf16>, vector<32x64xbf16>, vector<8x64xf32> -> vector<8x64xf32>
    %c0_31 = arith.constant 0 : index
    %c0_32 = arith.constant 0 : index
    %65 = vector.load %arg11[%c0_31, %c0_32] : memref<1x64xf32, #tpu.memory_space<vmem>>, vector<1x64xf32>
    %66 = vector.broadcast %65 : vector<1x64xf32> to vector<8x64xf32>
    %67 = arith.addf %64, %66 : vector<8x64xf32>
    %cst_33 = arith.constant 5.000000e-01 : f32
    %68 = vector.broadcast %cst_33 : f32 to vector<8x64xf32>
    %69 = arith.mulf %68, %67 : vector<8x64xf32>
    %cst_34 = arith.constant 0.707106769 : f32
    %70 = vector.broadcast %cst_34 : f32 to vector<8x64xf32>
    %71 = arith.mulf %67, %70 : vector<8x64xf32>
    %72 = math.erf %71 : vector<8x64xf32>
    %cst_35 = arith.constant 1.000000e+00 : f32
    %73 = vector.broadcast %cst_35 : f32 to vector<8x64xf32>
    %74 = arith.addf %73, %72 : vector<8x64xf32>
    %75 = arith.mulf %69, %74 : vector<8x64xf32>
    %76 = arith.truncf %75 : vector<8x64xf32> to vector<8x64xbf16>
    %c0_36 = arith.constant 0 : index
    %c0_37 = arith.constant 0 : index
    %77 = vector.load %arg12[%c0_36, %c0_37] : memref<64x32xbf16, #tpu.memory_space<vmem>>, vector<64x32xbf16>
    %cst_38 = arith.constant dense<0.000000e+00> : vector<8x32xf32>
    %78 = tpu.matmul %76, %77, %cst_38 {dimension_numbers = #tpu.dot_dimension_numbers<[1], [0], [0], [1], [0, 0, 1, 1], [], []>} : vector<8x64xbf16>, vector<64x32xbf16>, vector<8x32xf32> -> vector<8x32xf32>
    %c0_39 = arith.constant 0 : index
    %c0_40 = arith.constant 0 : index
    %79 = vector.load %arg13[%c0_39, %c0_40] : memref<1x32xf32, #tpu.memory_space<vmem>>, vector<1x32xf32>
    %80 = vector.broadcast %79 : vector<1x32xf32> to vector<8x32xf32>
    %81 = arith.addf %78, %80 : vector<8x32xf32>
    %82 = arith.addf %81, %61 : vector<8x32xf32>
    %c0_41 = arith.constant 0 : index
    %c0_42 = arith.constant 0 : index
    %c0_43 = arith.constant 0 : index
    %83 = vector.load %arg14[%c0_41, %c0_42, %c0_43] : memref<1x8x32xf32, #tpu.memory_space<vmem>>, vector<1x8x32xf32>
    %84 = vector.shape_cast %83 : vector<1x8x32xf32> to vector<8x32xf32>
    %85 = vector.shape_cast %82 : vector<8x32xf32> to vector<1x8x32xf32>
    tpu.vector_store %arg14[%c0_41, %c0_42, %c0_43], %85 {strides = array<i32>} : memref<1x8x32xf32, #tpu.memory_space<vmem>>, vector<1x8x32xf32>,
    return
  }
  func.func @transform_0(%arg0: i32, %arg1: i32) -> (i32, i32, i32) {
    %c0_i32 = arith.constant 0 : i32
    %c0_i32_0 = arith.constant 0 : i32
    %c0_i32_1 = arith.constant 0 : i32
    return %arg0, %c0_i32, %c0_i32_0 : i32, i32, i32
  }
  func.func @transform_1(%arg0: i32, %arg1: i32) -> (i32, i32) {
    %c0_i32 = arith.constant 0 : i32
    %c0_i32_0 = arith.constant 0 : i32
    %c0_i32_1 = arith.constant 0 : i32
    return %c0_i32, %c0_i32_0 : i32, i32
  }
  func.func @transform_2(%arg0: i32, %arg1: i32) -> (i32, i32) {
    %c0_i32 = arith.constant 0 : i32
    %c0_i32_0 = arith.constant 0 : i32
    %c0_i32_1 = arith.constant 0 : i32
    return %c0_i32, %c0_i32_0 : i32, i32
  }
  func.func @transform_3(%arg0: i32, %arg1: i32) -> (i32, i32) {
    %c0_i32 = arith.constant 0 : i32
    %c0_i32_0 = arith.constant 0 : i32
    %c0_i32_1 = arith.constant 0 : i32
    return %c0_i32, %c0_i32_0 : i32, i32
  }
  func.func @transform_4(%arg0: i32, %arg1: i32) -> (i32, i32) {
    %c0_i32 = arith.constant 0 : i32
    %c0_i32_0 = arith.constant 0 : i32
    %c0_i32_1 = arith.constant 0 : i32
    return %c0_i32, %c0_i32_0 : i32, i32
  }
  func.func @transform_5(%arg0: i32, %arg1: i32) -> (i32, i32) {
    %c0_i32 = arith.constant 0 : i32
    %c0_i32_0 = arith.constant 0 : i32
    %c0_i32_1 = arith.constant 0 : i32
    return %c0_i32, %c0_i32_0 : i32, i32
  }
  func.func @transform_6(%arg0: i32, %arg1: i32) -> (i32, i32) {
    %c0_i32 = arith.constant 0 : i32
    %c0_i32_0 = arith.constant 0 : i32
    %c0_i32_1 = arith.constant 0 : i32
    return %c0_i32, %c0_i32_0 : i32, i32
  }
  func.func @transform_7(%arg0: i32, %arg1: i32) -> (i32, i32) {
    %c0_i32 = arith.constant 0 : i32
    %c0_i32_0 = arith.constant 0 : i32
    %c0_i32_1 = arith.constant 0 : i32
    return %c0_i32, %c0_i32_0 : i32, i32
  }
  func.func @transform_8(%arg0: i32, %arg1: i32) -> (i32, i32) {
    %c0_i32 = arith.constant 0 : i32
    %c0_i32_0 = arith.constant 0 : i32
    %c0_i32_1 = arith.constant 0 : i32
    return %c0_i32, %c0_i32_0 : i32, i32
  }
  func.func @transform_9(%arg0: i32, %arg1: i32) -> (i32, i32) {
    %c0_i32 = arith.constant 0 : i32
    %c0_i32_0 = arith.constant 0 : i32
    %c0_i32_1 = arith.constant 0 : i32
    return %c0_i32, %c0_i32_0 : i32, i32
  }
  func.func @transform_10(%arg0: i32, %arg1: i32) -> (i32, i32) {
    %c0_i32 = arith.constant 0 : i32
    %c0_i32_0 = arith.constant 0 : i32
    %c0_i32_1 = arith.constant 0 : i32
    return %c0_i32, %c0_i32_0 : i32, i32
  }
  func.func @transform_11(%arg0: i32, %arg1: i32) -> (i32, i32) {
    %c0_i32 = arith.constant 0 : i32
    %c0_i32_0 = arith.constant 0 : i32
    %c0_i32_1 = arith.constant 0 : i32
    return %c0_i32, %c0_i32_0 : i32, i32
  }
  func.func @transform_12(%arg0: i32, %arg1: i32) -> (i32, i32, i32) {
    %c0_i32 = arith.constant 0 : i32
    %c0_i32_0 = arith.constant 0 : i32
    return %arg0, %arg1, %c0_i32 : i32, i32, i32
  }
}

module attributes {stable_mosaic.version = 11 : i64} {
  func.func @layer_kernel(%arg0: i32, %arg1: i32, %arg2: memref<1x8x32xf32, #tpu.memory_space<vmem>>, %arg3: memref<1x32xf32, #tpu.memory_space<vmem>>, %arg4: memref<1x32xf32, #tpu.memory_space<vmem>>, %arg5: memref<32x32xbf16, #tpu.memory_space<vmem>>, %arg6: memref<32x32xbf16, #tpu.memory_space<vmem>>, %arg7: memref<32x32xbf16, #tpu.memory_space<vmem>>, %arg8: memref<32x32xbf16, #tpu.memory_space<vmem>>, %arg9: memref<1x32xf32, #tpu.memory_space<vmem>>, %arg10: memref<32x64xbf16, #tpu.memory_space<vmem>>, %arg11: memref<1x64xf32, #tpu.memory_space<vmem>>, %arg12: memref<64x32xbf16, #tpu.memory_space<vmem>>, %arg13: memref<1x32xf32, #tpu.memory_space<vmem>>, %arg14: memref<1x8x32xf32, #tpu.memory_space<vmem>>, %arg15: memref<4x8x8xbf16, #tpu.memory_space<vmem>>, %arg16: memref<4x8x8xbf16, #tpu.memory_space<vmem>>) attributes {dimension_semantics = [#tpu.dimension_semantics<parallel>, #tpu.dimension_semantics<arbitrary>], iteration_bounds = array<i64: 2, 1>, scalar_prefetch = 0 : i64, scratch_operands = 2 : i64, tpu.core_type = #tpu.core_type<tc>, window_params = [{transform_indices = @transform_0, window_bounds = array<i64: 1, 8, 32>}, {pipeline_mode = #tpu.pipeline_mode<synchronous>, transform_indices = @transform_1, window_bounds = array<i64: 1, 32>}, {pipeline_mode = #tpu.pipeline_mode<synchronous>, transform_indices = @transform_2, window_bounds = array<i64: 1, 32>}, {pipeline_mode = #tpu.pipeline_mode<synchronous>, transform_indices = @transform_3, window_bounds = array<i64: 32, 32>}, {pipeline_mode = #tpu.pipeline_mode<synchronous>, transform_indices = @transform_4, window_bounds = array<i64: 32, 32>}, {pipeline_mode = #tpu.pipeline_mode<synchronous>, transform_indices = @transform_5, window_bounds = array<i64: 32, 32>}, {pipeline_mode = #tpu.pipeline_mode<synchronous>, transform_indices = @transform_6, window_bounds = array<i64: 32, 32>}, {pipeline_mode = #tpu.pipeline_mode<synchronous>, transform_indices = @transform_7, window_bounds = array<i64: 1, 32>}, {pipeline_mode = #tpu.pipeline_mode<synchronous>, transform_indices = @transform_8, window_bounds = array<i64: 32, 64>}, {pipeline_mode = #tpu.pipeline_mode<synchronous>, transform_indices = @transform_9, window_bounds = array<i64: 1, 64>}, {pipeline_mode = #tpu.pipeline_mode<synchronous>, transform_indices = @transform_10, window_bounds = array<i64: 64, 32>}, {pipeline_mode = #tpu.pipeline_mode<synchronous>, transform_indices = @transform_11, window_bounds = array<i64: 1, 32>}, {transform_indices = @transform_12, window_bounds = array<i64: 1, 8, 32>}]} {
    %c0 = arith.constant 0 : index
    %c0_0 = arith.constant 0 : index
    %0 = vector.load %arg3[%c0, %c0_0] : memref<1x32xf32, #tpu.memory_space<vmem>>, vector<1x32xf32>
    %c0_1 = arith.constant 0 : index
    %c0_2 = arith.constant 0 : index
    %1 = vector.load %arg4[%c0_1, %c0_2] : memref<1x32xf32, #tpu.memory_space<vmem>>, vector<1x32xf32>
    %c0_i32 = arith.constant 0 : i32
    %2 = arith.cmpi eq, %arg1, %c0_i32 : i32
    %3 = arith.extui %2 : i1 to i32
    %c0_i32_3 = arith.constant 0 : i32
    %4 = arith.cmpi ne, %3, %c0_i32_3 : i32
    scf.if %4 {
      %c0_44 = arith.constant 0 : index
      %c0_45 = arith.constant 0 : index
      %c0_46 = arith.constant 0 : index
      %86 = vector.load %arg2[%c0_44, %c0_45, %c0_46] : memref<1x8x32xf32, #tpu.memory_space<vmem>>, vector<1x8x32xf32>
      %87 = vector.shape_cast %86 : vector<1x8x32xf32> to vector<8x32xf32>
      %cst_47 = arith.constant dense<0.000000e+00> : vector<8xf32>
      %88 = vector.multi_reduction <add>, %87, %cst_47 [1] : vector<8x32xf32> to vector<8xf32>
      %89 = vector.shape_cast %88 : vector<8xf32> to vector<8x1xf32>
      %cst_48 = arith.constant 3.200000e+01 : f32
      %90 = vector.broadcast %cst_48 : f32 to vector<8x1xf32>
      %91 = arith.divf %89, %90 : vector<8x1xf32>
      %92 = vector.broadcast %91 : vector<8x1xf32> to vector<8x32xf32>
      %93 = arith.subf %87, %92 : vector<8x32xf32>
      %94 = arith.mulf %93, %93 : vector<8x32xf32>
      %cst_49 = arith.constant dense<0.000000e+00> : vector<8xf32>
      %95 = vector.multi_reduction <add>, %94, %cst_49 [1] : vector<8x32xf32> to vector<8xf32>
      %96 = vector.shape_cast %95 : vector<8xf32> to vector<8x1xf32>
      %cst_50 = arith.constant 3.200000e+01 : f32
      %97 = vector.broadcast %cst_50 : f32 to vector<8x1xf32>
      %98 = arith.divf %96, %97 : vector<8x1xf32>
      %99 = vector.broadcast %91 : vector<8x1xf32> to vector<8x32xf32>
      %100 = arith.subf %87, %99 : vector<8x32xf32>
      %cst_51 = arith.constant 9.99999974E-6 : f32
      %101 = vector.broadcast %cst_51 : f32 to vector<8x1xf32>
      %102 = arith.addf %98, %101 : vector<8x1xf32>
      %103 = math.rsqrt %102 : vector<8x1xf32>
      %104 = vector.broadcast %103 : vector<8x1xf32> to vector<8x32xf32>
      %105 = arith.mulf %100, %104 : vector<8x32xf32>
      %106 = vector.broadcast %0 : vector<1x32xf32> to vector<8x32xf32>
      %107 = arith.mulf %105, %106 : vector<8x32xf32>
      %108 = vector.broadcast %1 : vector<1x32xf32> to vector<8x32xf32>
      %109 = arith.addf %107, %108 : vector<8x32xf32>
      %110 = arith.truncf %109 : vector<8x32xf32> to vector<8x32xbf16>
      %c0_52 = arith.constant 0 : index
      %c0_53 = arith.constant 0 : index
      %111 = vector.load %arg6[%c0_52, %c0_53] : memref<32x32xbf16, #tpu.memory_space<vmem>>, vector<32x32xbf16>
      %cst_54 = arith.constant dense<0.000000e+00> : vector<8x32xf32>
      %112 = tpu.matmul %110, %111, %cst_54 {dimension_numbers = #tpu.dot_dimension_numbers<[1], [0], [0], [1], [0, 0, 1, 1], [], []>} : vector<8x32xbf16>, vector<32x32xbf16>, vector<8x32xf32> -> vector<8x32xf32>
      %c0_55 = arith.constant 0 : index
      %c0_56 = arith.constant 0 : index
      %113 = vector.load %arg7[%c0_55, %c0_56] : memref<32x32xbf16, #tpu.memory_space<vmem>>, vector<32x32xbf16>
      %cst_57 = arith.constant dense<0.000000e+00> : vector<8x32xf32>
      %114 = tpu.matmul %110, %113, %cst_57 {dimension_numbers = #tpu.dot_dimension_numbers<[1], [0], [0], [1], [0, 0, 1, 1], [], []>} : vector<8x32xbf16>, vector<32x32xbf16>, vector<8x32xf32> -> vector<8x32xf32>
      %115 = vector.shape_cast %112 : vector<8x32xf32> to vector<8x4x8xf32>
      %116 = tpu.transpose %115, [1, 0, 2] : vector<8x4x8xf32> -> vector<4x8x8xf32>
      %117 = arith.truncf %116 : vector<4x8x8xf32> to vector<4x8x8xbf16>
      %c0_58 = arith.constant 0 : index
      %c0_59 = arith.constant 0 : index
      %c0_60 = arith.constant 0 : index
      %118 = vector.load %arg15[%c0_58, %c0_59, %c0_60] : memref<4x8x8xbf16, #tpu.memory_space<vmem>>, vector<4x8x8xbf16>
      tpu.vector_store %arg15[%c0_58, %c0_59, %c0_60], %117 {strides = array<i32>} : memref<4x8x8xbf16, #tpu.memory_space<vmem>>, vector<4x8x8xbf16>,
      %119 = vector.shape_cast %114 : vector<8x32xf32> to vector<8x4x8xf32>
      %120 = tpu.transpose %119, [1, 0, 2] : vector<8x4x8xf32> -> vector<4x8x8xf32>
      %121 = arith.truncf %120 : vector<4x8x8xf32> to vector<4x8x8xbf16>
      %c0_61 = arith.constant 0 : index
      %c0_62 = arith.constant 0 : index
      %c0_63 = arith.constant 0 : index
      %122 = vector.load %arg16[%c0_61, %c0_62, %c0_63] : memref<4x8x8xbf16, #tpu.memory_space<vmem>>, vector<4x8x8xbf16>
      tpu.vector_store %arg16[%c0_61, %c0_62, %c0_63], %121 {strides = array<i32>} : memref<4x8x8xbf16, #tpu.memory_space<vmem>>, vector<4x8x8xbf16>,
    } else {
    }
    %c8_i32 = arith.constant 8 : i32
    %5 = arith.muli %arg1, %c8_i32 : i32
    %6 = tpu.assume_multiple %5, 8 : i32
    %c0_4 = arith.constant 0 : index
    %7 = arith.index_cast %6 : i32 to index
    %c0_5 = arith.constant 0 : index
    %8 = vector.load %arg2[%c0_4, %7, %c0_5] : memref<1x8x32xf32, #tpu.memory_space<vmem>>, vector<1x8x32xf32>
    %9 = vector.shape_cast %8 : vector<1x8x32xf32> to vector<8x32xf32>
    %cst = arith.constant dense<0.000000e+00> : vector<8xf32>
    %10 = vector.multi_reduction <add>, %9, %cst [1] : vector<8x32xf32> to vector<8xf32>
    %11 = vector.shape_cast %10 : vector<8xf32> to vector<8x1xf32>
    %cst_6 = arith.constant 3.200000e+01 : f32
    %12 = vector.broadcast %cst_6 : f32 to vector<8x1xf32>
    %13 = arith.divf %11, %12 : vector<8x1xf32>
    %14 = vector.broadcast %13 : vector<8x1xf32> to vector<8x32xf32>
    %15 = arith.subf %9, %14 : vector<8x32xf32>
    %16 = arith.mulf %15, %15 : vector<8x32xf32>
    %cst_7 = arith.constant dense<0.000000e+00> : vector<8xf32>
    %17 = vector.multi_reduction <add>, %16, %cst_7 [1] : vector<8x32xf32> to vector<8xf32>
    %18 = vector.shape_cast %17 : vector<8xf32> to vector<8x1xf32>
    %cst_8 = arith.constant 3.200000e+01 : f32
    %19 = vector.broadcast %cst_8 : f32 to vector<8x1xf32>
    %20 = arith.divf %18, %19 : vector<8x1xf32>
    %21 = vector.broadcast %13 : vector<8x1xf32> to vector<8x32xf32>
    %22 = arith.subf %9, %21 : vector<8x32xf32>
    %cst_9 = arith.constant 9.99999974E-6 : f32
    %23 = vector.broadcast %cst_9 : f32 to vector<8x1xf32>
    %24 = arith.addf %20, %23 : vector<8x1xf32>
    %25 = math.rsqrt %24 : vector<8x1xf32>
    %26 = vector.broadcast %25 : vector<8x1xf32> to vector<8x32xf32>
    %27 = arith.mulf %22, %26 : vector<8x32xf32>
    %28 = vector.broadcast %0 : vector<1x32xf32> to vector<8x32xf32>
    %29 = arith.mulf %27, %28 : vector<8x32xf32>
    %30 = vector.broadcast %1 : vector<1x32xf32> to vector<8x32xf32>
    %31 = arith.addf %29, %30 : vector<8x32xf32>
    %32 = arith.truncf %31 : vector<8x32xf32> to vector<8x32xbf16>
    %c0_10 = arith.constant 0 : index
    %c0_11 = arith.constant 0 : index
    %33 = vector.load %arg5[%c0_10, %c0_11] : memref<32x32xbf16, #tpu.memory_space<vmem>>, vector<32x32xbf16>
    %cst_12 = arith.constant dense<0.000000e+00> : vector<8x32xf32>
    %34 = tpu.matmul %32, %33, %cst_12 {dimension_numbers = #tpu.dot_dimension_numbers<[1], [0], [0], [1], [0, 0, 1, 1], [], []>} : vector<8x32xbf16>, vector<32x32xbf16>, vector<8x32xf32> -> vector<8x32xf32>
    %35 = vector.shape_cast %34 : vector<8x32xf32> to vector<8x4x8xf32>
    %36 = tpu.transpose %35, [1, 0, 2] : vector<8x4x8xf32> -> vector<4x8x8xf32>
    %37 = arith.truncf %36 : vector<4x8x8xf32> to vector<4x8x8xbf16>
    %c0_13 = arith.constant 0 : index
    %c0_14 = arith.constant 0 : index
    %c0_15 = arith.constant 0 : index
    %38 = vector.load %arg15[%c0_13, %c0_14, %c0_15] : memref<4x8x8xbf16, #tpu.memory_space<vmem>>, vector<4x8x8xbf16>
    "tpu.trace_start"() <{level = 10 : i32, message = "hqd,hkd->hqk"}> : () -> ()
    %cst_16 = arith.constant dense<0.000000e+00> : vector<4x8x8xf32>
    %39 = tpu.matmul %37, %38, %cst_16 {dimension_numbers = #tpu.dot_dimension_numbers<[2], [2], [1], [1], [0, 0, 0, 1, 1, 1], [0], [0]>} : vector<4x8x8xbf16>, vector<4x8x8xbf16>, vector<4x8x8xf32> -> vector<4x8x8xf32>
    "tpu.trace_stop"() : () -> ()
    %cst_17 = arith.constant dense<0xFF800000> : vector<4x8xf32>
    %40 = vector.multi_reduction <maximumf>, %39, %cst_17 [2] : vector<4x8x8xf32> to vector<4x8xf32>
    %41 = vector.shape_cast %40 : vector<4x8xf32> to vector<4x8x1xf32>
    %42 = vector.broadcast %41 : vector<4x8x1xf32> to vector<4x8x8xf32>
    %43 = arith.subf %39, %42 : vector<4x8x8xf32>
    %44 = math.exp %43 : vector<4x8x8xf32>
    %cst_18 = arith.constant dense<0.000000e+00> : vector<4x8xf32>
    %45 = vector.multi_reduction <add>, %44, %cst_18 [2] : vector<4x8x8xf32> to vector<4x8xf32>
    %46 = vector.shape_cast %45 : vector<4x8xf32> to vector<4x8x1xf32>
    %47 = arith.truncf %44 : vector<4x8x8xf32> to vector<4x8x8xbf16>
    %c0_19 = arith.constant 0 : index
    %c0_20 = arith.constant 0 : index
    %c0_21 = arith.constant 0 : index
    %48 = vector.load %arg16[%c0_19, %c0_20, %c0_21] : memref<4x8x8xbf16, #tpu.memory_space<vmem>>, vector<4x8x8xbf16>
    "tpu.trace_start"() <{level = 10 : i32, message = "hqk,hkd->hqd"}> : () -> ()
    %cst_22 = arith.constant dense<0.000000e+00> : vector<4x8x8xf32>
    %49 = tpu.matmul %47, %48, %cst_22 {dimension_numbers = #tpu.dot_dimension_numbers<[2], [1], [1], [2], [0, 0, 0, 1, 1, 2], [0], [0]>} : vector<4x8x8xbf16>, vector<4x8x8xbf16>, vector<4x8x8xf32> -> vector<4x8x8xf32>
    "tpu.trace_stop"() : () -> ()
    %50 = tpu.reciprocal %46 {approx = true} : vector<4x8x1xf32> -> vector<4x8x1xf32>
    %51 = vector.broadcast %50 : vector<4x8x1xf32> to vector<4x8x8xf32>
    %52 = arith.mulf %49, %51 : vector<4x8x8xf32>
    %53 = tpu.transpose %52, [1, 0, 2] : vector<4x8x8xf32> -> vector<8x4x8xf32>
    %54 = vector.shape_cast %53 : vector<8x4x8xf32> to vector<8x32xf32>
    %55 = arith.truncf %54 : vector<8x32xf32> to vector<8x32xbf16>
    %c0_23 = arith.constant 0 : index
    %c0_24 = arith.constant 0 : index
    %56 = vector.load %arg8[%c0_23, %c0_24] : memref<32x32xbf16, #tpu.memory_space<vmem>>, vector<32x32xbf16>
    %cst_25 = arith.constant dense<0.000000e+00> : vector<8x32xf32>
    %57 = tpu.matmul %55, %56, %cst_25 {dimension_numbers = #tpu.dot_dimension_numbers<[1], [0], [0], [1], [0, 0, 1, 1], [], []>} : vector<8x32xbf16>, vector<32x32xbf16>, vector<8x32xf32> -> vector<8x32xf32>
    %c0_26 = arith.constant 0 : index
    %c0_27 = arith.constant 0 : index
    %58 = vector.load %arg9[%c0_26, %c0_27] : memref<1x32xf32, #tpu.memory_space<vmem>>, vector<1x32xf32>
    %59 = vector.broadcast %58 : vector<1x32xf32> to vector<8x32xf32>
    %60 = arith.addf %57, %59 : vector<8x32xf32>
    %61 = arith.addf %60, %9 : vector<8x32xf32>
    %62 = arith.truncf %61 : vector<8x32xf32> to vector<8x32xbf16>
    %c0_28 = arith.constant 0 : index
    %c0_29 = arith.constant 0 : index
    %63 = vector.load %arg10[%c0_28, %c0_29] : memref<32x64xbf16, #tpu.memory_space<vmem>>, vector<32x64xbf16>
    %cst_30 = arith.constant dense<0.000000e+00> : vector<8x64xf32>
    %64 = tpu.matmul %62, %63, %cst_30 {dimension_numbers = #tpu.dot_dimension_numbers<[1], [0], [0], [1], [0, 0, 1, 1], [], []>} : vector<8x32xbf16>, vector<32x64xbf16>, vector<8x64xf32> -> vector<8x64xf32>
    %c0_31 = arith.constant 0 : index
    %c0_32 = arith.constant 0 : index
    %65 = vector.load %arg11[%c0_31, %c0_32] : memref<1x64xf32, #tpu.memory_space<vmem>>, vector<1x64xf32>
    %66 = vector.broadcast %65 : vector<1x64xf32> to vector<8x64xf32>
    %67 = arith.addf %64, %66 : vector<8x64xf32>
    %cst_33 = arith.constant 5.000000e-01 : f32
    %68 = vector.broadcast %cst_33 : f32 to vector<8x64xf32>
    %69 = arith.mulf %68, %67 : vector<8x64xf32>
    %cst_34 = arith.constant 0.707106769 : f32
    %70 = vector.broadcast %cst_34 : f32 to vector<8x64xf32>
    %71 = arith.mulf %67, %70 : vector<8x64xf32>
    %72 = math.erf %71 : vector<8x64xf32>
    %cst_35 = arith.constant 1.000000e+00 : f32
    %73 = vector.broadcast %cst_35 : f32 to vector<8x64xf32>
    %74 = arith.addf %73, %72 : vector<8x64xf32>
    %75 = arith.mulf %69, %74 : vector<8x64xf32>
    %76 = arith.truncf %75 : vector<8x64xf32> to vector<8x64xbf16>
    %c0_36 = arith.constant 0 : index
    %c0_37 = arith.constant 0 : index
    %77 = vector.load %arg12[%c0_36, %c0_37] : memref<64x32xbf16, #tpu.memory_space<vmem>>, vector<64x32xbf16>
    %cst_38 = arith.constant dense<0.000000e+00> : vector<8x32xf32>
    %78 = tpu.matmul %76, %77, %cst_38 {dimension_numbers = #tpu.dot_dimension_numbers<[1], [0], [0], [1], [0, 0, 1, 1], [], []>} : vector<8x64xbf16>, vector<64x32xbf16>, vector<8x32xf32> -> vector<8x32xf32>
    %c0_39 = arith.constant 0 : index
    %c0_40 = arith.constant 0 : index
    %79 = vector.load %arg13[%c0_39, %c0_40] : memref<1x32xf32, #tpu.memory_space<vmem>>, vector<1x32xf32>
    %80 = vector.broadcast %79 : vector<1x32xf32> to vector<8x32xf32>
    %81 = arith.addf %78, %80 : vector<8x32xf32>
    %82 = arith.addf %81, %61 : vector<8x32xf32>
    %c0_41 = arith.constant 0 : index
    %c0_42 = arith.constant 0 : index
    %c0_43 = arith.constant 0 : index
    %83 = vector.load %arg14[%c0_41, %c0_42, %c0_43] : memref<1x8x32xf32, #tpu.memory_space<vmem>>, vector<1x8x32xf32>
    %84 = vector.shape_cast %83 : vector<1x8x32xf32> to vector<8x32xf32>
    %85 = vector.shape_cast %82 : vector<8x32xf32> to vector<1x8x32xf32>
    tpu.vector_store %arg14[%c0_41, %c0_42, %c0_43], %85 {strides = array<i32>} : memref<1x8x32xf32, #tpu.memory_space<vmem>>, vector<1x8x32xf32>,
    return
  }
  func.func @transform_0(%arg0: i32, %arg1: i32) -> (i32, i32, i32) {
    %c0_i32 = arith.constant 0 : i32
    %c0_i32_0 = arith.constant 0 : i32
    %c0_i32_1 = arith.constant 0 : i32
    return %arg0, %c0_i32, %c0_i32_0 : i32, i32, i32
  }
  func.func @transform_1(%arg0: i32, %arg1: i32) -> (i32, i32) {
    %c0_i32 = arith.constant 0 : i32
    %c0_i32_0 = arith.constant 0 : i32
    %c0_i32_1 = arith.constant 0 : i32
    return %c0_i32, %c0_i32_0 : i32, i32
  }
  func.func @transform_2(%arg0: i32, %arg1: i32) -> (i32, i32) {
    %c0_i32 = arith.constant 0 : i32
    %c0_i32_0 = arith.constant 0 : i32
    %c0_i32_1 = arith.constant 0 : i32
    return %c0_i32, %c0_i32_0 : i32, i32
  }
  func.func @transform_3(%arg0: i32, %arg1: i32) -> (i32, i32) {
    %c0_i32 = arith.constant 0 : i32
    %c0_i32_0 = arith.constant 0 : i32
    %c0_i32_1 = arith.constant 0 : i32
    return %c0_i32, %c0_i32_0 : i32, i32
  }
  func.func @transform_4(%arg0: i32, %arg1: i32) -> (i32, i32) {
    %c0_i32 = arith.constant 0 : i32
    %c0_i32_0 = arith.constant 0 : i32
    %c0_i32_1 = arith.constant 0 : i32
    return %c0_i32, %c0_i32_0 : i32, i32
  }
  func.func @transform_5(%arg0: i32, %arg1: i32) -> (i32, i32) {
    %c0_i32 = arith.constant 0 : i32
    %c0_i32_0 = arith.constant 0 : i32
    %c0_i32_1 = arith.constant 0 : i32
    return %c0_i32, %c0_i32_0 : i32, i32
  }
  func.func @transform_6(%arg0: i32, %arg1: i32) -> (i32, i32) {
    %c0_i32 = arith.constant 0 : i32
    %c0_i32_0 = arith.constant 0 : i32
    %c0_i32_1 = arith.constant 0 : i32
    return %c0_i32, %c0_i32_0 : i32, i32
  }
  func.func @transform_7(%arg0: i32, %arg1: i32) -> (i32, i32) {
    %c0_i32 = arith.constant 0 : i32
    %c0_i32_0 = arith.constant 0 : i32
    %c0_i32_1 = arith.constant 0 : i32
    return %c0_i32, %c0_i32_0 : i32, i32
  }
  func.func @transform_8(%arg0: i32, %arg1: i32) -> (i32, i32) {
    %c0_i32 = arith.constant 0 : i32
    %c0_i32_0 = arith.constant 0 : i32
    %c0_i32_1 = arith.constant 0 : i32
    return %c0_i32, %c0_i32_0 : i32, i32
  }
  func.func @transform_9(%arg0: i32, %arg1: i32) -> (i32, i32) {
    %c0_i32 = arith.constant 0 : i32
    %c0_i32_0 = arith.constant 0 : i32
    %c0_i32_1 = arith.constant 0 : i32
    return %c0_i32, %c0_i32_0 : i32, i32
  }
  func.func @transform_10(%arg0: i32, %arg1: i32) -> (i32, i32) {
    %c0_i32 = arith.constant 0 : i32
    %c0_i32_0 = arith.constant 0 : i32
    %c0_i32_1 = arith.constant 0 : i32
    return %c0_i32, %c0_i32_0 : i32, i32
  }
  func.func @transform_11(%arg0: i32, %arg1: i32) -> (i32, i32) {
    %c0_i32 = arith.constant 0 : i32
    %c0_i32_0 = arith.constant 0 : i32
    %c0_i32_1 = arith.constant 0 : i32
    return %c0_i32, %c0_i32_0 : i32, i32
  }
  func.func @transform_12(%arg0: i32, %arg1: i32) -> (i32, i32, i32) {
    %c0_i32 = arith.constant 0 : i32
    %c0_i32_0 = arith.constant 0 : i32
    return %arg0, %arg1, %c0_i32 : i32, i32, i32
  }
}

</mosaic_0001>

<bundles_post_ra>
// kernel: tpu_custom_call.1
= control target key start
LH: loop header
LB: loop body
LE: loop exit
PB: predicated region body
PF: predicated region fallthrough
CT: control target
= control target key end

     0   :  { %s3188_s0 = inlined_call_operand.vmem [shape: f32[2,8,32], index: 0, kind: input, shape index: {}]   ;;  %s3189_s1 = inlined_call_operand.vmem [shape: f32[1,32], index: 1, kind: input, shape index: {}]   ;;  %s3190_s2 = inlined_call_operand.vmem [shape: f32[1,32], index: 2, kind: input, shape index: {}]   ;;  %s3191_s3 = inlined_call_operand.vmem [shape: bf16[32,32], index: 3, kind: input, shape index: {}]   ;;  %s3192_s4 = inlined_call_operand.vmem [shape: bf16[32,32], index: 4, kind: input, shape index: {}]   ;;  %s3193_s5 = inlined_call_operand.hbm [shape: bf16[32,32], index: 5, kind: input, shape index: {}]   ;;  %s3194_s6 = inlined_call_operand.hbm [shape: bf16[32,32], index: 6, kind: input, shape index: {}]   ;;  %s3195_s7 = inlined_call_operand.hbm [shape: f32[1,32], index: 7, kind: input, shape index: {}]   ;;  %s3196_s8 = inlined_call_operand.hbm [shape: bf16[32,64], index: 8, kind: input, shape index: {}]   ;;  %s3197_s9 = inlined_call_operand.hbm [shape: f32[1,64], index: 9, kind: input, shape index: {}]   ;;  %s3198_s10 = inlined_call_operand.vmem [shape: bf16[64,32], index: 10, kind: input, shape index: {}]   ;;  %s3199_s11 = inlined_call_operand.vmem [shape: f32[1,32], index: 11, kind: input, shape index: {}]   ;;  %s3200_s12 = inlined_call_operand.hbm [shape: f32[2,8,32], index: 12, kind: output, shape index: {}]  }
   0x1   :  { %3206 = sst [smem:[#allocation24_spill]] %s3194_s6 }
   0x2   :  { %17 = vsyncpa [#allocation5], 0 }
   0x3   :  { %18 = vsyncpa [#allocation8], 0 }
   0x4   :  { %19 = vsyncpa [#allocation11], 0 }
   0x5   :  { %20 = vsyncpa [#allocation6], 0 }
   0x6   :  { %22 = vsyncpa [#allocation6 + $0x1], 0  ;;  %s2791_s21 = smov 0   ;;  %s2793_s22 = smov 0  }
   0x7   :  { %s2795_s23 = smov 0   ;;  %s2797_s24 = smov 0  }
   0x8   :  { %s2799_s25 = smov 0   ;;  %s2801_s26 = smov 0  }
   0x9 LB: > { %3207 = sst [smem:[#allocation18_spill]] %s2686_s21  ;;  %s2136_s27 = sadd.s32 4294967295, %s2706_s26   ;;  %s2706_s26 = sphi %s2801_s26, %s28_s26   ;;  %s2702_s25 = sphi %s2799_s25, %s3226_s25   ;;  %s2698_s24 = sphi %s2797_s24, %s3225_s24   ;;  %s2694_s23 = sphi %s2795_s23, %s3224_s23   ;;  %s2690_s22 = sphi %s2793_s22, %s3228_s22   ;;  %s2686_s21 = sphi %s2791_s21, %s3227_s21  }
   0xa   : > { %3208 = sst [smem:[#allocation19_spill]] %s2694_s23  ;;  %s2137_s28 = sadd.s32 4294967294, %s2706_s26  }
   0xb   : > { %3209 = sst [smem:[#allocation20_spill]] %s2702_s25  ;;  %s40_s29 = sadd.s32 1, %s2702_s25 }
   0xc   : > { %s306_s30 = sadd.s32 1, %s2694_s23  ;;  %p42_p0 = scmp.ge.s32.totalorder %s40_s29, 2 }
   0xd   : > { %p316_p1 = scmp.ne.s32.totalorder %s2694_s23, %s2690_s22  ;;  %p317_p2 = scmp.eq.s32.totalorder %s2136_s27, 1 }
   0xe   : > { %p322_p3 = scmp.ne.s32.totalorder %s2690_s22, %s2686_s21  ;;  %s3230_s29 = smov (%p42_p0, %s40_s29), 0 }
   0xf   : > { %3210 = sst [smem:[#allocation21_spill]] %s3230_s29  ;;  %p2831_p4 = por %p317_p2, %p316_p1 }
  0x10   : > { %p323_p5 = scmp.eq.s32.totalorder %s2137_s28, 1  ;;  %s301_s14 = ssub.s32 %s2702_s25, %s3230_s29 }
  0x11   : > { %p2138_p6 = scmp.ge.s32.totalorder %s2706_s26, 1  ;;  %p304_p7 = scmp.eq.s32.totalorder %s301_s14, 0 }
  0x12   : > { %p2838_p8 = por %p323_p5, %p322_p3  ;;  %p330_p9 = scmp.lt.s32.totalorder %s2706_s26, 3 }
  0x13   : > { %s2844_s16 = scalar_select %p304_p7, %s2694_s23, %s306_s30  }
  0x14   : > { %s3212_s15 = scalar_select %p2838_p8, 1, 0 }
  0x15   : > { %3214 = sst [smem:[#allocation23_spill]] %s2844_s16  ;;  %p2846_p10 = pnand %p2138_p6, %p330_p9 }
  0x16   : > { %3213 = sst [smem:[#allocation22_spill]] %s3212_s15  ;;  %p2850_p11 = scmp.eq.s32.totalorder %s2136_s27, 0 }
  0x17   : > { %p2356_p12 = pneg %p2846_p10  ;;  %s2708_s19 = smov [#allocation7]  }
  0x18   : > { %s367_s20 = sshll.u32 %s2708_s19, 4  ;;  %s2709_s30 = smov [#allocation10]   ;;  %s368_s20 = int_to_ptr.vmem [resolvable:$true] %s367_s20 }
  0x19   : > { %p2858_p13 = pnand %p2850_p11, %p2356_p12  ;;  %s391_s14 = sshll.u32 %s2709_s30, 4  ;;  %s392_s14 = int_to_ptr.vmem [resolvable:$true] %s391_s14 }
  0x1a   : > { %s2499_s29 = scalar_lea.vmem %s368_s20, 256  ;;  %p2507_p5 = scmp.lt.s32.totalorder %s368_s20, %s368_s20 }
  0x1b   : > { %p2864_p0 = pneg %p2858_p13  ;;  %p2500_p1 = scmp.ne.s32.totalorder %s368_s20, %s2499_s29 }
  0x1c   : > { %p2508_p6 = scmp.lt.s32.totalorder %s2499_s29, %s2499_s29 }
  0x1d   : > { %p2502_p2 = pnand %p2500_p1, %p2864_p0 }
  0x1e   : > { %p2509_p7 = por %p2508_p6, %p2507_p5 }
  0x1f   : > { %p2503_p3 = pneg %p2502_p2 }
  0x21   : > { %p2510_p9 = pnand %p2509_p7, %p2503_p3 }
  0x23   : > { %2513 = shalt.err (!%p2510_p9)
}
  0x24   : > { %s2710_s19 = smov 64   ;;  %s2711_s30 = smov 4  }
  0x25   : > { %s3219_s6 = sld [smem:[#allocation24_spill]]  ;;  %s2525_s23 = scalar_lea.vmem %s392_s14, 256 }
  0x26   : > { %p2526_p12 = scmp.ne.s32.totalorder %s392_s14, %s2525_s23  ;;  %p2533_p5 = scmp.lt.s32.totalorder %s392_s14, %s392_s14 }
  0x27   : > { %p2534_p3 = scmp.lt.s32.totalorder %s2525_s23, %s2525_s23 }
  0x28   : > { %p2528_p1 = pnand %p2526_p12, %p2864_p0 }
  0x29   : > { %p2535_p6 = por %p2534_p3, %p2533_p5 }
  0x2a   : > { %p2529_p2 = pneg %p2528_p1 }
  0x2b   : > { %2362 = dma.hbm_to_vmem [thread:$0]  (!%p2858_p13), %s3219_s6, 256, %s368_s20, [#allocation8], %s2710_s19, %s2710_s19, %s2711_s30  }
  0x2c   : > { %p2536_p7 = pnand %p2535_p6, %p2529_p2 }
  0x2e   : > { %2539 = shalt.err (!%p2536_p7)
}
  0x2f   : > { %2368 = dma.hbm_to_vmem [thread:$0]  (!%p2858_p13), %s3196_s8, 256, %s392_s14, [#allocation11], %s2710_s19, %s2710_s19, %s2711_s30  }
  0x30   : > { %s2712_s25 = smov [#allocation4]   ;;  %s2713_s20 = smov [#allocation9]  }
  0x31   : > { %s354_s16 = sshll.u32 %s2712_s25, 4  ;;  %s381_s6 = sshll.u32 %s2713_s20, 4  ;;  %s355_s16 = int_to_ptr.vmem [resolvable:$true] %s354_s16  ;;  %s382_s6 = int_to_ptr.vmem [resolvable:$true] %s381_s6 }
  0x32   : > { %s2551_s21 = scalar_lea.vmem %s355_s16, 256  ;;  %p2559_p2 = scmp.lt.s32.totalorder %s355_s16, %s355_s16 }
  0x33   : > { %p2552_p9 = scmp.ne.s32.totalorder %s355_s16, %s2551_s21  ;;  %p2560_p5 = scmp.lt.s32.totalorder %s2551_s21, %s2551_s21 }
  0x35   : > { %p2554_p12 = pnand %p2552_p9, %p2864_p0  ;;  %p2561_p3 = por %p2560_p5, %p2559_p2 }
  0x37   : > { %p2555_p1 = pneg %p2554_p12 }
  0x39   : > { %p2562_p6 = pnand %p2561_p3, %p2555_p1 }
  0x3b   : > { %2565 = shalt.err (!%p2562_p6)
}
  0x3c   : > { %2359 = dma.hbm_to_vmem [thread:$0]  (!%p2858_p13), %s3193_s5, 256, %s355_s16, [#allocation5], %s2710_s19, %s2710_s19, %s2711_s30  }
  0x3d   : > { %s2577_s14 = scalar_lea.vmem %s382_s6, 16  ;;  %s2584_s21 = scalar_lea.vmem %s382_s6, 32 }
  0x3e   : > { %p2578_p7 = scmp.ne.s32.totalorder %s382_s6, %s2577_s14  ;;  %p2585_p2 = scmp.lt.s32.totalorder %s382_s6, %s382_s6 }
  0x3f   : > { %p2586_p1 = scmp.lt.s32.totalorder %s2584_s21, %s2577_s14 }
  0x40   : > { %p2580_p9 = pnand %p2578_p7, %p2864_p0 }
  0x41   : > { %p2587_p5 = por %p2586_p1, %p2585_p2 }
  0x42   : > { %p2581_p12 = pneg %p2580_p9 }
  0x44   : > { %p2588_p3 = pnand %p2587_p5, %p2581_p12 }
  0x46   : > { %2591 = shalt.err (!%p2588_p3)
}
  0x47   : > { %2365 = dma.hbm_to_vmem [thread:$0]  (!%p2858_p13), %s3195_s7, 16, %s382_s6, [#allocation8]  }
  0x48   : > { %s2714_s19 = smov [#allocation12]  }
  0x49   : > { %s405_s30 = sshll.u32 %s2714_s19, 4  ;;  %s406_s30 = int_to_ptr.vmem [resolvable:$true] %s405_s30 }
  0x4a   : > { %s2603_s16 = scalar_lea.vmem %s406_s30, 16  ;;  %s2610_s20 = scalar_lea.vmem %s406_s30, 32 }
  0x4b   : > { %p2604_p6 = scmp.ne.s32.totalorder %s406_s30, %s2603_s16  ;;  %p2611_p8 = scmp.lt.s32.totalorder %s406_s30, %s406_s30 }
  0x4c   : > { %p2612_p2 = scmp.lt.s32.totalorder %s2610_s20, %s2603_s16 }
  0x4d   : > { %p2606_p7 = pnand %p2604_p6, %p2864_p0 }
  0x4e   : > { %p2613_p12 = por %p2612_p2, %p2611_p8 }
  0x4f   : > { %p2607_p9 = pneg %p2606_p7 }
  0x51   : > { %p2614_p1 = pnand %p2613_p12, %p2607_p9 }
  0x53   : > { %2617 = shalt.err (!%p2614_p1)
}
  0x54   : > { %2371 = dma.hbm_to_vmem [thread:$0]  (!%p2858_p13), %s3197_s9, 16, %s406_s30, [#allocation11]  }
  0x55   : > { %431 = sbr.rel (%p2846_p10) target bundleno = 2086 (0x826), region = 68 }
  0x5a   : > { %2669 = dma.done.wait (%p2850_p11), [#allocation5], 256  }
  0x5b   : > { %2671 = vsyncadd (%p2850_p11), [#allocation5], 4294967040 }
  0x5c   : > { %2673 = dma.done.wait (%p2850_p11), [#allocation8], 272  }
  0x5d   : > { %2675 = vsyncadd (%p2850_p11), [#allocation8], 4294967024 }
  0x5e   : > { %2677 = dma.done.wait (%p2850_p11), [#allocation11], 272  }
  0x5f   : > { %2679 = vsyncadd (%p2850_p11), [#allocation11], 4294967024  ;;  %p488_p8 = scmp.lt.s32.totalorder %s2698_s24, 1  ;;  %vm500_vm0 = vcmask 261120   ;;  %v2452_v12 = vld [vmem:[%s3192_s4 + $0x8] sm:$0xff]   ;;  %v2715_v14 = vmov 0.0   ;;  %v516_v49 = vlaneseq }
  0x60   : > { %v2453_v13 = vld [vmem:[#allocation4 + $0x8] sm:$0xff]   ;;  %2234 = vmatprep.subr.bf16.mxu0 %v2715_v14  ;;  %2242 = vmatprep.subr.bf16.mxu1 %v2715_v14  ;;  %v2454_v15 = vld [vmem:[%s3192_s4] sm:$0xff]   ;;  %vm2716_vm1 = vmmov 0   ;;  %s2717_s28 = smov 112   ;;  %s2718_s27 = smov 120   ;;  %vm795_vm2 = vcmask 60416  }
  0x61   : > { %s489_s6 = scalar_select %p488_p8, %s2698_s24, 1  ;;  %2235 = vmatpush3.bf16.msra.mxu0 %v2452_v12  ;;  %2243 = vmatpush3.bf16.msra.mxu1 %v2453_v13  ;;  %v2455_v16 = vld [vmem:[#allocation4] sm:$0xff]   ;;  %v2456_v31 = vld [vmem:[%s3191_s3 + $0x8] sm:$0xff]   ;;  %v2720_v50 = vmov 1983009808   ;;  %v517_v54 = vshrl.u32 %v516_v49, 7 }
  0x62   : > { %2236 = vmatprep.subr.bf16.mxu0 %v2715_v14  ;;  %2244 = vmatprep.subr.bf16.mxu1 %v2715_v14  ;;  %v2196_v24 = vld [vmem:[%s3189_s1] ss:$0 sm:$0xff]  ;;  %v658_v51 = vunpack.c.l.s4 %v2720_v50  ;;  %v2721_v52 = vmov 1934713408   ;;  %vm1200_vm3 = vcmask 64512   ;;  %vm1432_vm4 = vcmask 1043456  }
  0x63   : > { %s2152_s17 = sshll.u32 %s489_s6, 3  ;;  %2238 = vmatprep.mubr.msk.bf16.mxu0 %vm2716_vm1, %v2715_v14  ;;  %2246 = vmatprep.mubr.msk.bf16.mxu1 %vm2716_vm1, %v2715_v14  ;;  %v2197_v26 = vld [vmem:[%s3190_s2] ss:$0 sm:$0xff]  ;;  %v690_v53 = vunpack.c.l.s4 %v2721_v52  ;;  %s2722_s18 = smov 16   ;;  %vm1771_vm5 = vcmask 130048   ;;  %vm1773_vm6 = vcmask 195584  }
  0x64   : > { %s491_s14 = scalar_lea.vmem %s3188_s0, %s2152_s17  ;;  %v2457_v34 = vld [vmem:[%s3191_s3] sm:$0xff]   ;;  %v659_v55 = vunpack.c.0.s8 %v658_v51  ;;  %s2723_s21 = smov 8   ;;  %vm1955_vm7 = vcmask 523264  }
  0x65   : > { %v2931_v0 = vld [vmem:[%s491_s14] sm:$0xff]  ;;  %2237 = vmatpush3.bf16.msra.mxu0 %v2454_v15  ;;  %2245 = vmatpush3.bf16.msra.mxu1 %v2455_v16  ;;  %s2719_s14 = smov 104   ;;  %v691_v57 = vunpack.c.0.s8 %v690_v53  ;;  %s2724_s29 = smov 24  }
  0x66   : > { %v501_v1 = vsel %vm500_vm0, %v2931_v0, 0.0  ;;  %2250 = vmatprep.subr.bf16.mxu0 %v2715_v14  ;;  %2258 = vmatprep.subr.bf16.mxu1 %v2715_v14  ;;  %v2983_v58 = vsub.s32 %v659_v55, %v517_v54  ;;  %s485_s17 = sand.u32 1, %s2690_s22   ;;  %s2725_s20 = smov [#allocation13]  }
  0x67   : > { %502 = vadd.xlane.f32.xlu0 %v501_v1  ;;  %s2622_s23 = sshll.u32 %s2725_s20, 4  ;;  %s2623_s23 = int_to_ptr.vmem [resolvable:$false] %s2622_s23 }
  0x68   : > { %s2624_s15 = scalar_lea.vmem %s2623_s23, 256 }
  0x6b   : > { %959 = vadd.xlane.f32.xlu0 %v501_v1 }
  0xf0   : > { %v503_v2 = vpop.xlane.xlu0 %502 }
  0xf1   : > { %v505_v3 = vmul.f32 0.03125, %v503_v2  ;;  %v2985_v2 = vsub.s32 %v691_v57, %v517_v54 }
  0xf3   : > { %v506_v4 = vsub.f32 %v2931_v0, %v505_v3 }
  0xf4   : > { %v960_v5 = vpop.xlane.xlu0 %959 }
  0xf5   : > { %v962_v6 = vmul.f32 0.03125, %v960_v5  ;;  %v507_v7 = vmul.f32 %v506_v4, %v506_v4 }
  0xf7   : > { %v963_v8 = vsub.f32 %v2931_v0, %v962_v6  ;;  %v508_v9 = vsel %vm500_vm0, %v507_v7, 0.0 }
  0xf8   : > { %509 = vadd.xlane.f32.xlu1 %v508_v9 }
  0xf9   : > { %v964_v10 = vmul.f32 %v963_v8, %v963_v8 }
  0xfb   : > { %v965_v11 = vsel %vm500_vm0, %v964_v10, 0.0 }
  0xfc   : > { %966 = vadd.xlane.f32.xlu1 %v965_v11 }
 0x181   : > { %v510_v17 = vpop.xlane.xlu1 %509 }
 0x182   : > { %v511_v18 = vmul.f32 0.03125, %v510_v17 }
 0x184   : > { %v512_v19 = vadd.f32 1e-05, %v511_v18 }
 0x185   : > { %v967_v20 = vpop.xlane.xlu1 %966 }
 0x186   : > { %2466 = vrsqrt.f32 %v512_v19  ;;  %v968_v21 = vmul.f32 0.03125, %v967_v20 }
 0x188   : > { %v969_v22 = vadd.f32 1e-05, %v968_v21 }
 0x18a   : > { %2468 = vrsqrt.f32 %v969_v22 }
 0x193   : > { %v2467_v23 = vpop.eup %2466 }
 0x194   : > { %v514_v25 = vmul.f32 %v2467_v23, %v506_v4 }
 0x196   : > { %v521_v27 = vmul.f32 %v2196_v24, %v514_v25 }
 0x197   : > { %v2469_v28 = vpop.eup %2468 }
 0x198   : > { %v528_v29 = vadd.f32 %v2197_v26, %v521_v27  ;;  %v971_v30 = vmul.f32 %v2469_v28, %v963_v8 }
 0x19a   : > { %v529_v32 = vpack.c.bf16 %v528_v29, %v528_v29  ;;  %v978_v33 = vmul.f32 %v2196_v24, %v971_v30 }
 0x19c   : > { %2239 = vmatmul.mubr.msk.bf16.vlgmr.msra.gmra.mxu0 %vm500_vm0, %v529_v32  ;;  %2247 = vmatmul.mubr.msk.bf16.vlgmr.msra.gmra.mxu1 %vm500_vm0, %v529_v32  ;;  %v985_v35 = vadd.f32 %v2197_v26, %v978_v33 }
 0x19d   : > { %2251 = vmatpush3.bf16.msra.mxu0 %v2456_v31  ;;  %2254 = vmatprep.mubr.msk.bf16.mxu0 %vm2716_vm1, %v2715_v14 }
 0x19e   : > { %2252 = vmatprep.subr.bf16.mxu0 %v2715_v14  ;;  %2260 = vmatprep.mubr.msk.bf16.mxu1 %vm2716_vm1, %v2715_v14  ;;  %v986_v36 = vpack.c.bf16 %v985_v35, %v985_v35 }
 0x1a1   : > { %2253 = vmatpush3.bf16.msra.mxu0 %v2457_v34 }
 0x1a2   : > { %2264 = vmatprep.subr.bf16.mxu0 %v2715_v14 }
 0x1a4   : > { %2255 = vmatmul.mubr.msk.bf16.vlgmr.msra.gmra.mxu0 %vm500_vm0, %v986_v36 }
 0x1a5   : > { %2266 = vmatprep.mubr.msk.bf16.mxu0 %vm2716_vm1, %v2715_v14 }
 0x25c   : > { %v583_v37 = vpop.f32.mrf.mxu0  ;;  %v2978_v38 = vpop.f32.mrf.mxu1 }
 0x25d   : > { %649 = vrot.lane.b32.xlu1 %v583_v37, %s2717_s28  ;;  %646 = vrot.lane.b32.xlu0 %v583_v37, %s2718_s27 }
 0x25e   : > { %v2240_v39 = vpop.f32.mrf.mxu0  ;;  %v2248_v40 = vpop.f32.mrf.mxu1 }
 0x260   : > { %v586_v41 = vpop.f32.mrf.mxu0  ;;  %v642_v42 = vpop.f32.mrf.mxu1 }
 0x261   : > { %652 = vrot.lane.b32.xlu1 %v583_v37, %s2719_s14 }
 0x262   : > { %v2241_v43 = vpop.f32.mrf.mxu0  ;;  %v2249_v44 = vpop.f32.mrf.mxu1 }
 0x264   : > { %v1040_v45 = vpop.f32.mrf.mxu0 }
 0x265   : > { %1050 = vrot.lane.b32.xlu0 %v1040_v45, %s2717_s28  ;;  %1047 = vrot.lane.b32.xlu1 %v1040_v45, %s2718_s27 }
 0x266   : > { %v2256_v46 = vpop.f32.mrf.mxu0 }
 0x268   : > { %v1043_v47 = vpop.f32.mrf.mxu0 }
 0x269   : > { %801 = vrot.lane.b32.xlu0 %v2978_v38, %s2718_s27  ;;  %1053 = vrot.lane.b32.xlu1 %v1040_v45, %s2719_s14 }
 0x26a   : > { %v2257_v48 = vpop.f32.mrf.mxu0 }
 0x26d   : > { %807 = vrot.lane.b32.xlu0 %v2978_v38, %s2719_s14  ;;  %804 = vrot.lane.b32.xlu1 %v2978_v38, %s2717_s28  ;;  %s2151_s28 = sshll.u32 %s485_s17, 3 }
 0x2cf   : > { %v650_v56 = vpop.permute.xlu1 %649  ;;  %v647_v61 = vpop.permute.xlu0 %646 }
 0x2d0   : > { %v655_v59 = vcombine.low %v583_v37, %v650_v56  ;;  %v656_v60 = vcombine.high %v583_v37, %v650_v56 }
 0x2d2   : > { %v663_v3 = vrot.slane %v655_v59, %v2983_v58  ;;  %v670_v4 = vrot.slane %v656_v60, %v2983_v58 }
 0x2d3   : > { %v653_v62 = vpop.permute.xlu1 %652 }
 0x2d4   : > { %v671_v63 = vcombine.low %v647_v61, %v653_v62  ;;  %v672_v1 = vcombine.high %v647_v61, %v653_v62 }
 0x2d6   : > { %v679_v5 = vrot.slane %v671_v63, %v2983_v58  ;;  %v686_v6 = vrot.slane %v672_v1, %v2983_v58 }
 0x2d7   : > { %v1048_v7 = vpop.permute.xlu1 %1047  ;;  %v1051_v12 = vpop.permute.xlu0 %1050 }
 0x2d8   : > { %v687_v8 = vcombine.low %v663_v3, %v679_v5  ;;  %v688_v9 = vcombine.high %v663_v3, %v679_v5  ;;  %v703_v10 = vcombine.low %v670_v4, %v686_v6  ;;  %v704_v11 = vcombine.high %v670_v4, %v686_v6 }
 0x2d9   : > { %v1056_v18 = vcombine.low %v1040_v45, %v1051_v12  ;;  %v1057_v19 = vcombine.high %v1040_v45, %v1051_v12 }
 0x2da   : > { %v695_v13 = vrot.slane %v687_v8, %v2985_v2  ;;  %v702_v15 = vrot.slane %v688_v9, %v2985_v2  ;;  %v711_v16 = vrot.slane %v703_v10, %v2985_v2  ;;  %v718_v17 = vrot.slane %v704_v11, %v2985_v2 }
 0x2db   : > { %v1054_v20 = vpop.permute.xlu1 %1053  ;;  %v1064_v31 = vrot.slane %v1056_v18, %v2983_v58  ;;  %v1071_v32 = vrot.slane %v1057_v19, %v2983_v58  ;;  %v802_v33 = vpop.permute.xlu0 %801 }
 0x2dc   : > { %v723_v21 = vcombine.low %v695_v13, %v702_v15  ;;  %v2159_v22 = vcombine.high %v695_v13, %v702_v15  ;;  %v739_v23 = vcombine.low %v711_v16, %v718_v17  ;;  %v2160_v24 = vcombine.high %v711_v16, %v718_v17 }
 0x2dd   : > { %v1072_v25 = vcombine.low %v1048_v7, %v1054_v20  ;;  %v1073_v26 = vcombine.high %v1048_v7, %v1054_v20 }
 0x2de   : > { %v730_v27 = vrot.slane %v723_v21, %v2983_v58  ;;  %v738_v28 = vrot.slane %v2159_v22, %v2983_v58  ;;  %v746_v29 = vrot.slane %v739_v23, %v2983_v58  ;;  %v754_v30 = vrot.slane %v2160_v24, %v2983_v58 }
 0x2df   : > { %v1080_v34 = vrot.slane %v1072_v25, %v2983_v58  ;;  %v1087_v35 = vrot.slane %v1073_v26, %v2983_v58  ;;  %v808_v62 = vpop.permute.xlu0 %807  ;;  %v805_v63 = vpop.permute.xlu1 %804 }
 0x2e0   : > { %v755_v36 = vcombine.low %v730_v27, %v738_v28  ;;  %v756_v37 = vcombine.high %v730_v27, %v738_v28  ;;  %v771_v39 = vcombine.low %v746_v29, %v754_v30  ;;  %v772_v40 = vcombine.high %v746_v29, %v754_v30 }
 0x2e1   : > { %v1088_v41 = vcombine.low %v1064_v31, %v1080_v34  ;;  %v1089_v42 = vcombine.high %v1064_v31, %v1080_v34  ;;  %v1104_v43 = vcombine.low %v1071_v32, %v1087_v35  ;;  %v1105_v44 = vcombine.high %v1071_v32, %v1087_v35 }
 0x2e2   : > { %v763_v45 = vrot.slane %v755_v36, %v2985_v2  ;;  %v770_v46 = vrot.slane %v756_v37, %v2985_v2  ;;  %v779_v47 = vrot.slane %v771_v39, %v2985_v2  ;;  %v786_v48 = vrot.slane %v772_v40, %v2985_v2 }
 0x2e3   : > { %v1096_v49 = vrot.slane %v1088_v41, %v2985_v2  ;;  %v1103_v50 = vrot.slane %v1089_v42, %v2985_v2  ;;  %v1112_v51 = vrot.slane %v1104_v43, %v2985_v2  ;;  %v1119_v52 = vrot.slane %v1105_v44, %v2985_v2 }
 0x2e4   : > { %v787_v53 = vcombine.low %v763_v45, %v779_v47  ;;  %v788_v54 = vcombine.high %v763_v45, %v779_v47  ;;  %v789_v55 = vcombine.low %v770_v46, %v786_v48  ;;  %v790_v56 = vcombine.high %v770_v46, %v786_v48 }
 0x2e5   : > { %v1124_v57 = vcombine.low %v1096_v49, %v1103_v50  ;;  %v2166_v59 = vcombine.high %v1096_v49, %v1103_v50  ;;  %v1140_v60 = vcombine.low %v1112_v51, %v1119_v52  ;;  %v2167_v61 = vcombine.high %v1112_v51, %v1119_v52 }
 0x2e6   : > { %v791_v1 = vpack.c.bf16 %v787_v53, %v787_v53  ;;  %v792_v3 = vpack.c.bf16 %v788_v54, %v788_v54  ;;  %v793_v4 = vpack.c.bf16 %v789_v55, %v789_v55  ;;  %v794_v5 = vpack.c.bf16 %v790_v56, %v790_v56 }
 0x2e7   : > { %v1131_v6 = vrot.slane %v1124_v57, %v2983_v58  ;;  %v1139_v7 = vrot.slane %v2166_v59, %v2983_v58  ;;  %v1147_v8 = vrot.slane %v1140_v60, %v2983_v58  ;;  %v1155_v9 = vrot.slane %v2167_v61, %v2983_v58 }
 0x2e8   : > { %796 = vst.msk [vmem:[#allocation2] sm:$0xf] %vm795_vm2, %v791_v1  ;;  %797 = vst.msk [vmem:[#allocation2 + $0x4] sm:$0xf] %vm795_vm2, %v792_v3  ;;  %v826_v10 = vcombine.low %v802_v33, %v808_v62  ;;  %v827_v11 = vcombine.high %v802_v33, %v808_v62  ;;  %v810_v12 = vcombine.low %v2978_v38, %v805_v63 }
 0x2e9   : > { %798 = vst.msk [vmem:[#allocation2 + $0x8] sm:$0xf] %vm795_vm2, %v793_v4  ;;  %799 = vst.msk [vmem:[#allocation2 + $0xc] sm:$0xf] %vm795_vm2, %v794_v5  ;;  %v811_v13 = vcombine.high %v2978_v38, %v805_v63  ;;  %v1156_v19 = vcombine.low %v1131_v6, %v1139_v7  ;;  %v1172_v20 = vcombine.low %v1147_v8, %v1155_v9 }
 0x2ea   : > { %v834_v15 = vrot.slane %v826_v10, %v2983_v58  ;;  %v841_v16 = vrot.slane %v827_v11, %v2983_v58  ;;  %v818_v17 = vrot.slane %v810_v12, %v2983_v58  ;;  %v1157_v36 = vcombine.high %v1131_v6, %v1139_v7 }
 0x2eb   : > { %v825_v18 = vrot.slane %v811_v13, %v2983_v58  ;;  %v1164_v30 = vrot.slane %v1156_v19, %v2985_v2  ;;  %v1180_v31 = vrot.slane %v1172_v20, %v2985_v2  ;;  %v1173_v44 = vcombine.high %v1147_v8, %v1155_v9 }
 0x2ec   : > { %v842_v21 = vcombine.low %v818_v17, %v834_v15  ;;  %v843_v22 = vcombine.high %v818_v17, %v834_v15  ;;  %v1171_v60 = vrot.slane %v1157_v36, %v2985_v2 }
 0x2ed   : > { %v858_v23 = vcombine.low %v825_v18, %v841_v16  ;;  %v859_v24 = vcombine.high %v825_v18, %v841_v16  ;;  %v1188_v45 = vcombine.low %v1164_v30, %v1180_v31  ;;  %v1189_v46 = vcombine.high %v1164_v30, %v1180_v31 }
 0x2ee   : > { %v850_v25 = vrot.slane %v842_v21, %v2985_v2  ;;  %v857_v26 = vrot.slane %v843_v22, %v2985_v2  ;;  %v1187_v61 = vrot.slane %v1173_v44, %v2985_v2 }
 0x2ef   : > { %v866_v38 = vrot.slane %v858_v23, %v2985_v2  ;;  %v873_v27 = vrot.slane %v859_v24, %v2985_v2  ;;  %v1196_v28 = vld [vmem:[#allocation2] sm:$0xf]  ;;  %v1197_v29 = vld [vmem:[#allocation2 + $0x4] sm:$0xf]  ;;  %v1192_v57 = vpack.c.bf16 %v1188_v45, %v1188_v45  ;;  %v1193_v59 = vpack.c.bf16 %v1189_v46, %v1189_v46 }
 0x2f0   : > { %v878_v32 = vcombine.low %v850_v25, %v857_v26  ;;  %v2161_v33 = vcombine.high %v850_v25, %v857_v26  ;;  %v1205_v37 = vsel %vm1200_vm3, %v1196_v28, 0  ;;  %v1251_v39 = vsel %vm1200_vm3, %v1197_v29, 0  ;;  %v1198_v55 = vld [vmem:[#allocation2 + $0x8] sm:$0xf]  ;;  %v1199_v56 = vld [vmem:[#allocation2 + $0xc] sm:$0xf] }
 0x2f1   : > { %v894_v34 = vcombine.low %v866_v38, %v873_v27  ;;  %v2162_v35 = vcombine.high %v866_v38, %v873_v27  ;;  %2259 = vmatpush3.bf16.xpose.msra.mxu1 %v1205_v37  ;;  %2265 = vmatpush3.bf16.xpose.msra.mxu0 %v1251_v39  ;;  %v1297_v4 = vsel %vm1200_vm3, %v1198_v55, 0  ;;  %v1343_v5 = vsel %vm1200_vm3, %v1199_v56, 0 }
 0x2f2   : > { %v885_v40 = vrot.slane %v878_v32, %v2983_v58  ;;  %v893_v41 = vrot.slane %v2161_v33, %v2983_v58  ;;  %2270 = vmatprep.subr.bf16.mxu1 %v2715_v14  ;;  %2276 = vmatprep.subr.bf16.mxu0 %v2715_v14  ;;  %v1190_v10 = vcombine.low %v1171_v60, %v1187_v61 }
 0x2f3   : > { %v901_v42 = vrot.slane %v894_v34, %v2983_v58  ;;  %v909_v43 = vrot.slane %v2162_v35, %v2983_v58  ;;  %v1191_v11 = vcombine.high %v1171_v60, %v1187_v61 }
 0x2f4   : > { %v910_v47 = vcombine.low %v885_v40, %v893_v41  ;;  %v911_v48 = vcombine.high %v885_v40, %v893_v41  ;;  %v1194_v12 = vpack.c.bf16 %v1190_v10, %v1190_v10 }
 0x2f5   : > { %v926_v49 = vcombine.low %v901_v42, %v909_v43  ;;  %v927_v50 = vcombine.high %v901_v42, %v909_v43  ;;  %v1195_v13 = vpack.c.bf16 %v1191_v11, %v1191_v11 }
 0x2f6   : > { %v918_v51 = vrot.slane %v910_v47, %v2985_v2  ;;  %v925_v52 = vrot.slane %v911_v48, %v2985_v2 }
 0x2f7   : > { %v934_v53 = vrot.slane %v926_v49, %v2985_v2  ;;  %v941_v54 = vrot.slane %v927_v50, %v2985_v2 }
 0x2f8   : > { %2261 = vmatmul.mubr.msk.bf16.vlgmr.msra.gmra.mxu1 %vm1200_vm3, %v1192_v57  ;;  %2267 = vmatmul.mubr.msk.bf16.vlgmr.msra.gmra.mxu0 %vm1200_vm3, %v1193_v59 }
 0x2f9   : > { %v942_v62 = vcombine.low %v918_v51, %v934_v53  ;;  %v943_v63 = vcombine.high %v918_v51, %v934_v53  ;;  %v944_v1 = vcombine.low %v925_v52, %v941_v54  ;;  %v945_v3 = vcombine.high %v925_v52, %v941_v54  ;;  %2271 = vmatpush3.bf16.xpose.msra.mxu1 %v1297_v4 }
 0x2fa   : > { %2277 = vmatpush3.bf16.xpose.msra.mxu0 %v1343_v5  ;;  %2272 = vmatprep.mubr.msk.bf16.mxu1 %vm2716_vm1, %v2715_v14 }
 0x2fb   : > { %v946_v6 = vpack.c.bf16 %v942_v62, %v942_v62  ;;  %v947_v7 = vpack.c.bf16 %v943_v63, %v943_v63  ;;  %v948_v8 = vpack.c.bf16 %v944_v1, %v944_v1  ;;  %v949_v9 = vpack.c.bf16 %v945_v3, %v945_v3  ;;  %2278 = vmatprep.mubr.msk.bf16.mxu0 %vm2716_vm1, %v2715_v14 }
 0x2fc   : > { %2282 = vmatprep.subr.bf16.mxu1 %v2715_v14  ;;  %2288 = vmatprep.subr.bf16.mxu0 %v2715_v14 }
 0x2fd   : > { %950 = vst.msk [vmem:[#allocation3] sm:$0xf] %vm795_vm2, %v946_v6  ;;  %951 = vst.msk [vmem:[#allocation3 + $0x4] sm:$0xf] %vm795_vm2, %v947_v7 }
 0x2fe   : > { %952 = vst.msk [vmem:[#allocation3 + $0x8] sm:$0xf] %vm795_vm2, %v948_v8  ;;  %953 = vst.msk [vmem:[#allocation3 + $0xc] sm:$0xf] %vm795_vm2, %v949_v9 }
 0x300   : > { %2273 = vmatmul.mubr.msk.bf16.vlgmr.msra.gmra.mxu1 %vm1200_vm3, %v1194_v12 }
 0x301   : > { %2279 = vmatmul.mubr.msk.bf16.vlgmr.msra.gmra.mxu0 %vm1200_vm3, %v1195_v13  ;;  %2284 = vmatprep.mubr.msk.bf16.mxu1 %vm2716_vm1, %v2715_v14 }
 0x302   : > { %2290 = vmatprep.mubr.msk.bf16.mxu0 %vm2716_vm1, %v2715_v14 }
 0x304   : > { %v1425_v15 = vld [vmem:[#allocation3] sm:$0xf]  ;;  %v1426_v16 = vld [vmem:[#allocation3 + $0x4] sm:$0xf] }
 0x305   : > { %v1434_v17 = vsel %vm1432_vm4, %v1425_v15, 0  ;;  %v1480_v18 = vsel %vm1432_vm4, %v1426_v16, 0  ;;  %v1427_v52 = vld [vmem:[#allocation3 + $0x8] sm:$0xf]  ;;  %v1428_v56 = vld [vmem:[#allocation3 + $0xc] sm:$0xf] }
 0x306   : > { %2283 = vmatpush3.bf16.msra.mxu1 %v1434_v17  ;;  %2289 = vmatpush3.bf16.msra.mxu0 %v1480_v18  ;;  %v1526_v60 = vsel %vm1432_vm4, %v1427_v52, 0  ;;  %v1572_v61 = vsel %vm1432_vm4, %v1428_v56, 0 }
 0x307   : > { %2294 = vmatprep.subr.bf16.mxu1 %v2715_v14  ;;  %2300 = vmatprep.subr.bf16.mxu0 %v2715_v14 }
 0x3b8   : > { %v1241_v19 = vpop.f32.mrf.mxu1  ;;  %v1287_v20 = vpop.f32.mrf.mxu0 }
 0x3b9   : > { %v1385_v21 = vsel %vm1200_vm3, %v1241_v19, -inf  ;;  %v1388_v23 = vsel %vm1200_vm3, %v1287_v20, -inf }
 0x3ba   : > { %1386 = vmax.xlane.f32.xlu1 %v1385_v21  ;;  %v2262_v22 = vpop.f32.mrf.mxu1  ;;  %1389 = vmax.xlane.f32.xlu0 %v1388_v23  ;;  %v2268_v24 = vpop.f32.mrf.mxu0 }
 0x3bc   : > { %v1244_v25 = vpop.f32.mrf.mxu1  ;;  %v1290_v26 = vpop.f32.mrf.mxu0 }
 0x3be   : > { %v2263_v38 = vpop.f32.mrf.mxu1  ;;  %v2269_v27 = vpop.f32.mrf.mxu0 }
 0x3c0   : > { %v1333_v28 = vpop.f32.mrf.mxu1 }
 0x3c1   : > { %v1379_v29 = vpop.f32.mrf.mxu0  ;;  %v1391_v30 = vsel %vm1200_vm3, %v1333_v28, -inf }
 0x3c2   : > { %v2274_v31 = vpop.f32.mrf.mxu1  ;;  %1392 = vmax.xlane.f32.xlu0 %v1391_v30  ;;  %v1394_v35 = vsel %vm1200_vm3, %v1379_v29, -inf }
 0x3c3   : > { %v2280_v32 = vpop.f32.mrf.mxu0 }
 0x3c4   : > { %v1336_v33 = vpop.f32.mrf.mxu1 }
 0x3c5   : > { %v1382_v34 = vpop.f32.mrf.mxu0 }
 0x3c6   : > { %v2275_v36 = vpop.f32.mrf.mxu1  ;;  %1395 = vmax.xlane.f32.xlu0 %v1394_v35 }
 0x3c7   : > { %v2281_v37 = vpop.f32.mrf.mxu0 }
 0x443   : > { %v1387_v39 = vpop.xlane.xlu1 %1386  ;;  %v1390_v41 = vpop.xlane.xlu0 %1389 }
 0x444   : > { %v1397_v40 = vsub.f32 %v1241_v19, %v1387_v39  ;;  %v1398_v42 = vsub.f32 %v1287_v20, %v1390_v41 }
 0x446   : > { %v1401_v43 = vmul.f32 1.442695, %v1397_v40  ;;  %v1403_v44 = vmul.f32 1.442695, %v1398_v42 }
 0x448   : > { %2470 = vpow2.f32 %v1401_v43 }
 0x449   : > { %2472 = vpow2.f32 %v1403_v44 }
 0x44b   : > { %v1393_v45 = vpop.xlane.xlu0 %1392 }
 0x44c   : > { %v1399_v46 = vsub.f32 %v1333_v28, %v1393_v45 }
 0x44e   : > { %v1405_v47 = vmul.f32 1.442695, %v1399_v46 }
 0x44f   : > { %v1396_v48 = vpop.xlane.xlu0 %1395 }
 0x450   : > { %2474 = vpow2.f32 %v1405_v47  ;;  %v1400_v49 = vsub.f32 %v1379_v29, %v1396_v48  ;;  %v2458_v47 = vld [vmem:[#allocation7 + $0x8] sm:$0xff]  }
 0x452   : > { %v1407_v50 = vmul.f32 1.442695, %v1400_v49 }
 0x454   : > { %2476 = vpow2.f32 %v1407_v50 }
 0x455   : > { %v2471_v51 = vpop.eup %2470 }
 0x456   : > { %v2473_v53 = vpop.eup %2472  ;;  %v1409_v54 = vsel %vm1200_vm3, %v2471_v51, 0.0  ;;  %v1421_v55 = vpack.c.bf16 %v2471_v51, %v2471_v51 }
 0x457   : > { %1410 = vadd.xlane.f32.xlu1 %v1409_v54  ;;  %v1412_v57 = vsel %vm1200_vm3, %v2473_v53, 0.0  ;;  %v1422_v59 = vpack.c.bf16 %v2473_v53, %v2473_v53 }
 0x458   : > { %1413 = vadd.xlane.f32.xlu0 %v1412_v57  ;;  %2285 = vmatmul.mubr.msk.bf16.vlgmr.msra.gmra.mxu1 %vm1200_vm3, %v1421_v55 }
 0x459   : > { %2291 = vmatmul.mubr.msk.bf16.vlgmr.msra.gmra.mxu0 %vm1200_vm3, %v1422_v59  ;;  %2295 = vmatpush3.bf16.msra.mxu1 %v1526_v60 }
 0x45a   : > { %2301 = vmatpush3.bf16.msra.mxu0 %v1572_v61  ;;  %2296 = vmatprep.mubr.msk.bf16.mxu1 %vm2716_vm1, %v2715_v14  ;;  %v2459_v61 = vld [vmem:[#allocation7] sm:$0xff]  }
 0x45b   : > { %2302 = vmatprep.mubr.msk.bf16.mxu0 %vm2716_vm1, %v2715_v14  ;;  %2306 = vmatprep.subr.bf16.mxu1 %v2715_v14 }
 0x45c   : > { %2314 = vmatprep.subr.bf16.mxu0 %v2715_v14 }
 0x45d   : > { %v2475_v62 = vpop.eup %2474 }
 0x45e   : > { %v1415_v63 = vsel %vm1200_vm3, %v2475_v62, 0.0  ;;  %v1423_v1 = vpack.c.bf16 %v2475_v62, %v2475_v62 }
 0x45f   : > { %1416 = vadd.xlane.f32.xlu1 %v1415_v63 }
 0x460   : > { %2297 = vmatmul.mubr.msk.bf16.vlgmr.msra.gmra.mxu1 %vm1200_vm3, %v1423_v1 }
 0x461   : > { %v2477_v3 = vpop.eup %2476  ;;  %2310 = vmatprep.mubr.msk.bf16.mxu1 %vm2716_vm1, %v2715_v14  ;;  %2307 = vmatpush3.bf16.msra.mxu1 %v2458_v47 }
 0x462   : > { %v1418_v4 = vsel %vm1200_vm3, %v2477_v3, 0.0  ;;  %v1424_v5 = vpack.c.bf16 %v2477_v3, %v2477_v3  ;;  %2308 = vmatprep.subr.bf16.mxu1 %v2715_v14 }
 0x463   : > { %1419 = vadd.xlane.f32.xlu0 %v1418_v4 }
 0x464   : > { %2303 = vmatmul.mubr.msk.bf16.vlgmr.msra.gmra.mxu0 %vm1200_vm3, %v1424_v5 }
 0x465   : > { %2318 = vmatprep.mubr.msk.bf16.mxu0 %vm2716_vm1, %v2715_v14  ;;  %2309 = vmatpush3.bf16.msra.mxu1 %v2459_v61 }
 0x466   : > { %2322 = vmatprep.subr.bf16.mxu1 %v2715_v14 }
 0x4e0   : > { %v1411_v6 = vpop.xlane.xlu1 %1410 }
 0x4e1   : > { %v1414_v7 = vpop.xlane.xlu0 %1413 }
 0x4e8   : > { %v1417_v8 = vpop.xlane.xlu1 %1416 }
 0x4e9   : > { %2478 = vrcp.f32 %v1417_v8 }
 0x4ea   : > { %2480 = vrcp.f32 %v1411_v6 }
 0x4eb   : > { %2482 = vrcp.f32 %v1414_v7 }
 0x4ec   : > { %v1420_v9 = vpop.xlane.xlu0 %1419 }
 0x4ed   : > { %2484 = vrcp.f32 %v1420_v9 }
 0x4f6   : > { %v2479_v19 = vpop.eup %2478 }
 0x4f7   : > { %v2481_v22 = vpop.eup %2480 }
 0x4f8   : > { %v2483_v24 = vpop.eup %2482 }
 0x4fa   : > { %v2485_v26 = vpop.eup %2484 }
 0x518   : > { %v1470_v10 = vpop.f32.mrf.mxu1 }
 0x519   : > { %v1516_v11 = vpop.f32.mrf.mxu0  ;;  %v1618_v25 = vmul.f32 %v2481_v22, %v1470_v10 }
 0x51a   : > { %v2286_v12 = vpop.f32.mrf.mxu1  ;;  %v1619_v28 = vmul.f32 %v2483_v24, %v1516_v11 }
 0x51b   : > { %v2292_v13 = vpop.f32.mrf.mxu0 }
 0x51c   : > { %v1473_v15 = vpop.f32.mrf.mxu1 }
 0x51d   : > { %v1519_v16 = vpop.f32.mrf.mxu0 }
 0x51e   : > { %v2287_v17 = vpop.f32.mrf.mxu1 }
 0x51f   : > { %v2293_v18 = vpop.f32.mrf.mxu0 }
 0x520   : > { %v1562_v20 = vpop.f32.mrf.mxu1  ;;  %v2460_v18 = vld [vmem:[#allocation10 + $0x8] sm:$0xff]  }
 0x521   : > { %v1620_v21 = vmul.f32 %v2479_v19, %v1562_v20  ;;  %2315 = vmatpush3.bf16.msra.mxu0 %v2460_v18  ;;  %v2461_v19 = vld [vmem:[#allocation10] sm:$0xff]   ;;  %v2178_v20 = vld [vmem:[#allocation9] ss:$0 sm:$0xff] }
 0x522   : > { %v2298_v23 = vpop.f32.mrf.mxu1  ;;  %2316 = vmatprep.subr.bf16.mxu0 %v2715_v14 }
 0x523   : > { %v1622_v29 = vcombine.low %v1618_v25, %v1620_v21  ;;  %v1623_v30 = vcombine.high %v1618_v25, %v1620_v21 }
 0x524   : > { %v1565_v38 = vpop.f32.mrf.mxu1  ;;  %v1608_v27 = vpop.f32.mrf.mxu0 }
 0x525   : > { %v1621_v31 = vmul.f32 %v2485_v26, %v1608_v27  ;;  %v1630_v37 = vrot.slane %v1622_v29, %v2983_v58  ;;  %v1637_v39 = vrot.slane %v1623_v30, %v2983_v58  ;;  %2317 = vmatpush3.bf16.msra.mxu0 %v2461_v19  ;;  %v2462_v27 = vld [vmem:[%s3198_s10 + $0x18] sm:$0xff]   ;;  %v2465_v29 = vld [vmem:[%s3198_s10] sm:$0xff]   ;;  %v2182_v30 = vld [vmem:[#allocation12] ss:$0 sm:$0xff] }
 0x526   : > { %v2299_v32 = vpop.f32.mrf.mxu1  ;;  %v2304_v33 = vpop.f32.mrf.mxu0 }
 0x527   : > { %v1638_v34 = vcombine.low %v1619_v28, %v1621_v31  ;;  %v1639_v35 = vcombine.high %v1619_v28, %v1621_v31  ;;  %v2463_v28 = vld [vmem:[%s3198_s10 + $0x10] sm:$0xff]  }
 0x528   : > { %v1611_v36 = vpop.f32.mrf.mxu0 }
 0x529   : > { %v1646_v40 = vrot.slane %v1638_v34, %v2983_v58  ;;  %v1653_v41 = vrot.slane %v1639_v35, %v2983_v58 }
 0x52a   : > { %v2305_v42 = vpop.f32.mrf.mxu0 }
 0x52b   : > { %v1654_v43 = vcombine.low %v1630_v37, %v1646_v40  ;;  %v1655_v44 = vcombine.high %v1630_v37, %v1646_v40  ;;  %v1670_v45 = vcombine.low %v1637_v39, %v1653_v41  ;;  %v1671_v46 = vcombine.high %v1637_v39, %v1653_v41 }
 0x52d   : > { %v1662_v48 = vrot.slane %v1654_v43, %v2985_v2  ;;  %v1669_v49 = vrot.slane %v1655_v44, %v2985_v2  ;;  %v1678_v50 = vrot.slane %v1670_v45, %v2985_v2  ;;  %v1685_v51 = vrot.slane %v1671_v46, %v2985_v2 }
 0x52f   : > { %v1690_v52 = vcombine.low %v1662_v48, %v1669_v49  ;;  %v2176_v53 = vcombine.high %v1662_v48, %v1669_v49  ;;  %v1706_v54 = vcombine.low %v1678_v50, %v1685_v51  ;;  %v2177_v55 = vcombine.high %v1678_v50, %v1685_v51 }
 0x531   : > { %v1697_v56 = vrot.slane %v1690_v52, %v2983_v58  ;;  %v1705_v57 = vrot.slane %v2176_v53, %v2983_v58  ;;  %v1713_v59 = vrot.slane %v1706_v54, %v2983_v58  ;;  %v1721_v60 = vrot.slane %v2177_v55, %v2983_v58 }
 0x533   : > { %v1723_v62 = vcombine.high %v1697_v56, %v1705_v57  ;;  %v1739_v63 = vcombine.high %v1713_v59, %v1721_v60  ;;  %v1722_v1 = vcombine.low %v1697_v56, %v1705_v57  ;;  %v1738_v3 = vcombine.low %v1713_v59, %v1721_v60 }
 0x535   : > { %v1737_v4 = vrot.slane %v1723_v62, %v2985_v2  ;;  %v1753_v5 = vrot.slane %v1739_v63, %v2985_v2  ;;  %v1730_v6 = vrot.slane %v1722_v1, %v2985_v2  ;;  %v1746_v7 = vrot.slane %v1738_v3, %v2985_v2 }
 0x537   : > { %v1756_v8 = vcombine.low %v1737_v4, %v1753_v5  ;;  %v1755_v9 = vcombine.high %v1730_v6, %v1746_v7  ;;  %v1754_v10 = vcombine.low %v1730_v6, %v1746_v7  ;;  %v1757_v58 = vcombine.high %v1737_v4, %v1753_v5 }
 0x539   : > { %1763 = vrot.lane.b32.xlu0 %v1756_v8, %s2722_s18  ;;  %1759 = vrot.lane.b32.xlu1 %v1755_v9, %s2723_s21  ;;  %s2193_s18 = sshll.u32 %s2698_s24, 7  ;;  %s487_s21 = scalar_lea.vmem [#allocation13], %s2151_s28 }
 0x53a   : > { %s3141_s30 = scalar_lea.hbm %s3200_s12, %s2193_s18  ;;  %s2002_s24 = scalar_lea.sflag [#allocation6], %s485_s17 }
 0x53d   : > { %1767 = vrot.lane.b32.xlu1 %v1757_v58, %s2724_s29  ;;  %s2016_s29 = sshll.u32 %s487_s21, 4  ;;  %s3143_s29 = int_to_ptr.vmem [resolvable:$true] %s2016_s29 }
 0x53e   : > { %s2618_s16 = scalar_lea.vmem %s3143_s29, 128  ;;  %p2625_p0 = scmp.lt.s32.totalorder %s3143_s29, %s2623_s23 }
 0x53f   : > { %p2619_p10 = scmp.ne.s32.totalorder %s3143_s29, %s2618_s16  ;;  %p2626_p5 = scmp.lt.s32.totalorder %s2624_s15, %s2618_s16 }
 0x541   : > { %p2620_p11 = pnand %p2619_p10, %p2831_p4  ;;  %p2627_p3 = por %p2626_p5, %p2625_p0 }
 0x543   : > { %p2621_p13 = pneg %p2620_p11 }
 0x545   : > { %p2628_p6 = pnand %p2627_p3, %p2621_p13 }
 0x5ab   : > { %v1760_v11 = vpop.permute.xlu1 %1759  ;;  %v1764_v12 = vpop.permute.xlu0 %1763 }
 0x5ac   : > { %v1770_v13 = vsel %vm1200_vm3, %v1754_v10, %v1760_v11 }
 0x5ad   : > { %v1772_v16 = vsel %vm1771_vm5, %v1770_v13, %v1764_v12 }
 0x5af   : > { %v1768_v15 = vpop.permute.xlu1 %1767 }
 0x5b0   : > { %v1774_v17 = vsel %vm1773_vm6, %v1772_v16, %v1768_v15 }
 0x5b1   : > { %v1775_v2 = vpack.c.bf16 %v1774_v17, %v1774_v17 }
 0x5b3   : > { %2311 = vmatmul.mubr.msk.bf16.vlgmr.msra.gmra.mxu1 %vm500_vm0, %v1775_v2 }
 0x5b4   : > { %2330 = vmatprep.mubr.msk.bf16.mxu1 %vm2716_vm1, %v2715_v14  ;;  %2323 = vmatpush3.bf16.msra.mxu1 %v2462_v27 }
 0x5b5   : > { %2324 = vmatprep.subr.bf16.mxu1 %v2715_v14 }
 0x5b8   : > { %2325 = vmatpush3.bf16.msra.mxu1 %v2463_v28 }
 0x5b9   : > { %2326 = vmatprep.subr.bf16.mxu1 %v2715_v14 }
 0x673   : > { %v1836_v21 = vpop.f32.mrf.mxu1 }
 0x674   : > { %v1837_v22 = vadd.f32 %v2178_v20, %v1836_v21 }
 0x675   : > { %v2312_v23 = vpop.f32.mrf.mxu1 }
 0x676   : > { %v1842_v24 = vadd.f32 %v1837_v22, %v2931_v0  ;;  %v2464_v0 = vld [vmem:[%s3198_s10 + $0x8] sm:$0xff]  }
 0x677   : > { %v1839_v25 = vpop.f32.mrf.mxu1  ;;  %2327 = vmatpush3.bf16.msra.mxu1 %v2464_v0 }
 0x678   : > { %v1843_v26 = vpack.c.bf16 %v1842_v24, %v1842_v24  ;;  %2328 = vmatprep.subr.bf16.mxu1 %v2715_v14  ;;  %v2186_v14 = vld [vmem:[%s3199_s11] ss:$0 sm:$0xff] }
 0x679   : > { %v2313_v38 = vpop.f32.mrf.mxu1 }
 0x67a   : > { %2319 = vmatmul.mubr.msk.bf16.vlgmr.msra.gmra.mxu0 %vm500_vm0, %v1843_v26 }
 0x67b   : > { %2329 = vmatpush3.bf16.msra.mxu1 %v2465_v29 }
 0x73a   : > { %v1904_v31 = vpop.f32.mrf.mxu0 }
 0x73b   : > { %v1905_v32 = vadd.f32 %v2182_v30, %v1904_v31 }
 0x73c   : > { %v2320_v33 = vpop.f32.mrf.mxu0 }
 0x73d   : > { %v1911_v34 = vmul.f32 0.70710677, %v1905_v32  ;;  %v1910_v39 = vmul.f32 0.5, %v1905_v32 }
 0x73e   : > { %v1907_v35 = vpop.f32.mrf.mxu0 }
 0x73f   : > { %2486 = verf.f32 %v1911_v34 }
 0x740   : > { %v2321_v36 = vpop.f32.mrf.mxu0 }
 0x74c   : > { %v2487_v37 = vpop.eup %2486 }
 0x74d   : > { %v1913_v40 = vadd.f32 1.0, %v2487_v37 }
 0x74f   : > { %v1914_v41 = vmul.f32 %v1913_v40, %v1910_v39 }
 0x751   : > { %v1915_v42 = vpack.c.bf16 %v1914_v41, %v1914_v41 }
 0x753   : > { %2331 = vmatmul.mubr.msk.bf16.vlgmr.msra.gmra.mxu1 %vm1955_vm7, %v1915_v42 }
 0x813   : > { %v1993_v43 = vpop.f32.mrf.mxu1 }
 0x814   : > { %v1994_v44 = vadd.f32 %v2186_v14, %v1993_v43 }
 0x815   : > { %v2332_v45 = vpop.f32.mrf.mxu1 }
 0x816   : > { %v1999_v46 = vadd.f32 %v1994_v44, %v1842_v24 }
 0x817   : > { %v1996_v47 = vpop.f32.mrf.mxu1 }
 0x818   : > { %2000 = vst.msk [vmem:[%s487_s21] sm:$0xff] %vm500_vm0, %v1999_v46 }
 0x819   : > { %v2333_v48 = vpop.f32.mrf.mxu1 }
 0x81a   : > { %2631 = shalt.err (!%p2628_p6)
}
 0x81b   : > { %s2632_s6 = scalar_lea.hbm %s3141_s30, 128  ;;  %s2636_s27 = scalar_lea.hbm %s3200_s12, 256 }
 0x81c   : > { %p2633_p7 = scmp.ne.s32.totalorder %s3141_s30, %s2632_s6  ;;  %p2637_p12 = scmp.lt.s32.totalorder %s3141_s30, %s3200_s12 }
 0x81d   : > { %p2638_p1 = scmp.lt.s32.totalorder %s2636_s27, %s2632_s6 }
 0x81e   : > { %p2634_p9 = pnand %p2633_p7, %p2831_p4 }
 0x81f   : > { %p2639_p8 = por %p2638_p1, %p2637_p12 }
 0x820   : > { %p2635_p2 = pneg %p2634_p9 }
 0x822   : > { %p2640_p10 = pnand %p2639_p8, %p2635_p2 }
 0x824   : > { %2643 = shalt.err (!%p2640_p10)
}
 0x825   : > { %2354 = dma.vmem_to_hbm [thread:$0]  (%p2831_p4), %s3143_s29, 128, %s3141_s30, %s2002_s24  }
 0x826 PF: > { %s3220_s21 = sld [smem:[#allocation18_spill]]  ;;  %p2386_p11 = scmp.ge.s32.totalorder %s2706_s26, 2 }
 0x827   : > { %s3221_s25 = sld [smem:[#allocation22_spill]] }
 0x82c   : > { %s2028_s19 = sand.u32 1, %s3220_s21  }
 0x82d   : > { %p3222_p13 = scmp.ne.s32.totalorder %s3221_s25, 0  ;;  %s2029_s16 = scalar_lea.sflag [#allocation6], %s2028_s19 }
 0x82f   : > { %p2373_p0 = pnand %p2386_p11, %p3222_p13 }
 0x831   : > { %p2374_p5 = pneg %p2373_p0 }
 0x833   : > { %2681 = dma.done.wait (%p2374_p5), %s2029_s16, 128  }
 0x834   : > { %2683 = vsyncadd (%p2374_p5), %s2029_s16, 4294967168  ;;  %s28_s26 = sadd.s32 1, %s2706_s26   ;;  %s3223_s13 = sld [smem:[#allocation19_spill]] }
 0x835   : > { %p25_p3 = scmp.ge.s32.totalorder %s28_s26, 4   ;;  %s3224_s23 = sld [smem:[#allocation23_spill]] }
 0x836   : > { %s3225_s24 = sld [smem:[#allocation20_spill]]  ;;  %s3227_s21 = smov %s2690_s22 }
 0x837   : > { %s3226_s25 = sld [smem:[#allocation21_spill]]  ;;  %27 = sbr.rel (!%p25_p3) target bundleno = 9 (0x9), region = 129 }
 0x83a   : > { %s3228_s22 = smov %s3223_s13 }
 0x83c   :  { %2034 = vsyncpa [#allocation5], 1 }
 0x83d   :  { %2036 = vsyncpa [#allocation5 + $0x1], 1 }
 0x83e   :  { %2037 = vsyncpa [#allocation8], 1 }
 0x83f   :  { %2038 = vsyncpa [#allocation11], 1 }
 0x840   :  { %2039 = vsyncpa [#allocation6], 1 }
 0x841   :  { %2041 = vsyncpa [#allocation6 + $0x1], 1 }

// kernel: tpu_custom_call.1
= control target key start
LH: loop header
LB: loop body
LE: loop exit
PB: predicated region body
PF: predicated region fallthrough
CT: control target
= control target key end

     0   :  { %s3188_s0 = inlined_call_operand.vmem [shape: f32[2,8,32], index: 0, kind: input, shape index: {}]   ;;  %s3189_s1 = inlined_call_operand.vmem [shape: f32[1,32], index: 1, kind: input, shape index: {}]   ;;  %s3190_s2 = inlined_call_operand.vmem [shape: f32[1,32], index: 2, kind: input, shape index: {}]   ;;  %s3191_s3 = inlined_call_operand.vmem [shape: bf16[32,32], index: 3, kind: input, shape index: {}]   ;;  %s3192_s4 = inlined_call_operand.vmem [shape: bf16[32,32], index: 4, kind: input, shape index: {}]   ;;  %s3193_s5 = inlined_call_operand.hbm [shape: bf16[32,32], index: 5, kind: input, shape index: {}]   ;;  %s3194_s6 = inlined_call_operand.hbm [shape: bf16[32,32], index: 6, kind: input, shape index: {}]   ;;  %s3195_s7 = inlined_call_operand.hbm [shape: f32[1,32], index: 7, kind: input, shape index: {}]   ;;  %s3196_s8 = inlined_call_operand.hbm [shape: bf16[32,64], index: 8, kind: input, shape index: {}]   ;;  %s3197_s9 = inlined_call_operand.hbm [shape: f32[1,64], index: 9, kind: input, shape index: {}]   ;;  %s3198_s10 = inlined_call_operand.vmem [shape: bf16[64,32], index: 10, kind: input, shape index: {}]   ;;  %s3199_s11 = inlined_call_operand.vmem [shape: f32[1,32], index: 11, kind: input, shape index: {}]   ;;  %s3200_s12 = inlined_call_operand.hbm [shape: f32[2,8,32], index: 12, kind: output, shape index: {}]  }
   0x1   :  { %3206 = sst [smem:[#allocation24_spill]] %s3194_s6 }
   0x2   :  { %17 = vsyncpa [#allocation5], 0 }
   0x3   :  { %18 = vsyncpa [#allocation8], 0 }
   0x4   :  { %19 = vsyncpa [#allocation11], 0 }
   0x5   :  { %20 = vsyncpa [#allocation6], 0 }
   0x6   :  { %22 = vsyncpa [#allocation6 + $0x1], 0  ;;  %s2791_s21 = smov 0   ;;  %s2793_s22 = smov 0  }
   0x7   :  { %s2795_s23 = smov 0   ;;  %s2797_s24 = smov 0  }
   0x8   :  { %s2799_s25 = smov 0   ;;  %s2801_s26 = smov 0  }
   0x9 LB: > { %3207 = sst [smem:[#allocation18_spill]] %s2686_s21  ;;  %s2136_s27 = sadd.s32 4294967295, %s2706_s26   ;;  %s2706_s26 = sphi %s2801_s26, %s28_s26   ;;  %s2702_s25 = sphi %s2799_s25, %s3226_s25   ;;  %s2698_s24 = sphi %s2797_s24, %s3225_s24   ;;  %s2694_s23 = sphi %s2795_s23, %s3224_s23   ;;  %s2690_s22 = sphi %s2793_s22, %s3228_s22   ;;  %s2686_s21 = sphi %s2791_s21, %s3227_s21  }
   0xa   : > { %3208 = sst [smem:[#allocation19_spill]] %s2694_s23  ;;  %s2137_s28 = sadd.s32 4294967294, %s2706_s26  }
   0xb   : > { %3209 = sst [smem:[#allocation20_spill]] %s2702_s25  ;;  %s40_s29 = sadd.s32 1, %s2702_s25 }
   0xc   : > { %s306_s30 = sadd.s32 1, %s2694_s23  ;;  %p42_p0 = scmp.ge.s32.totalorder %s40_s29, 2 }
   0xd   : > { %p316_p1 = scmp.ne.s32.totalorder %s2694_s23, %s2690_s22  ;;  %p317_p2 = scmp.eq.s32.totalorder %s2136_s27, 1 }
   0xe   : > { %p322_p3 = scmp.ne.s32.totalorder %s2690_s22, %s2686_s21  ;;  %s3230_s29 = smov (%p42_p0, %s40_s29), 0 }
   0xf   : > { %3210 = sst [smem:[#allocation21_spill]] %s3230_s29  ;;  %p2831_p4 = por %p317_p2, %p316_p1 }
  0x10   : > { %p323_p5 = scmp.eq.s32.totalorder %s2137_s28, 1  ;;  %s301_s14 = ssub.s32 %s2702_s25, %s3230_s29 }
  0x11   : > { %p2138_p6 = scmp.ge.s32.totalorder %s2706_s26, 1  ;;  %p304_p7 = scmp.eq.s32.totalorder %s301_s14, 0 }
  0x12   : > { %p2838_p8 = por %p323_p5, %p322_p3  ;;  %p330_p9 = scmp.lt.s32.totalorder %s2706_s26, 3 }
  0x13   : > { %s2844_s16 = scalar_select %p304_p7, %s2694_s23, %s306_s30  }
  0x14   : > { %s3212_s15 = scalar_select %p2838_p8, 1, 0 }
  0x15   : > { %3214 = sst [smem:[#allocation23_spill]] %s2844_s16  ;;  %p2846_p10 = pnand %p2138_p6, %p330_p9 }
  0x16   : > { %3213 = sst [smem:[#allocation22_spill]] %s3212_s15  ;;  %p2850_p11 = scmp.eq.s32.totalorder %s2136_s27, 0 }
  0x17   : > { %p2356_p12 = pneg %p2846_p10  ;;  %s2708_s19 = smov [#allocation7]  }
  0x18   : > { %s367_s20 = sshll.u32 %s2708_s19, 4  ;;  %s2709_s30 = smov [#allocation10]   ;;  %s368_s20 = int_to_ptr.vmem [resolvable:$true] %s367_s20 }
  0x19   : > { %p2858_p13 = pnand %p2850_p11, %p2356_p12  ;;  %s391_s14 = sshll.u32 %s2709_s30, 4  ;;  %s392_s14 = int_to_ptr.vmem [resolvable:$true] %s391_s14 }
  0x1a   : > { %s2499_s29 = scalar_lea.vmem %s368_s20, 256  ;;  %p2507_p5 = scmp.lt.s32.totalorder %s368_s20, %s368_s20 }
  0x1b   : > { %p2864_p0 = pneg %p2858_p13  ;;  %p2500_p1 = scmp.ne.s32.totalorder %s368_s20, %s2499_s29 }
  0x1c   : > { %p2508_p6 = scmp.lt.s32.totalorder %s2499_s29, %s2499_s29 }
  0x1d   : > { %p2502_p2 = pnand %p2500_p1, %p2864_p0 }
  0x1e   : > { %p2509_p7 = por %p2508_p6, %p2507_p5 }
  0x1f   : > { %p2503_p3 = pneg %p2502_p2 }
  0x21   : > { %p2510_p9 = pnand %p2509_p7, %p2503_p3 }
  0x23   : > { %2513 = shalt.err (!%p2510_p9)
}
  0x24   : > { %s2710_s19 = smov 64   ;;  %s2711_s30 = smov 4  }
  0x25   : > { %s3219_s6 = sld [smem:[#allocation24_spill]]  ;;  %s2525_s23 = scalar_lea.vmem %s392_s14, 256 }
  0x26   : > { %p2526_p12 = scmp.ne.s32.totalorder %s392_s14, %s2525_s23  ;;  %p2533_p5 = scmp.lt.s32.totalorder %s392_s14, %s392_s14 }
  0x27   : > { %p2534_p3 = scmp.lt.s32.totalorder %s2525_s23, %s2525_s23 }
  0x28   : > { %p2528_p1 = pnand %p2526_p12, %p2864_p0 }
  0x29   : > { %p2535_p6 = por %p2534_p3, %p2533_p5 }
  0x2a   : > { %p2529_p2 = pneg %p2528_p1 }
  0x2b   : > { %2362 = dma.hbm_to_vmem [thread:$0]  (!%p2858_p13), %s3219_s6, 256, %s368_s20, [#allocation8], %s2710_s19, %s2710_s19, %s2711_s30  }
  0x2c   : > { %p2536_p7 = pnand %p2535_p6, %p2529_p2 }
  0x2e   : > { %2539 = shalt.err (!%p2536_p7)
}
  0x2f   : > { %2368 = dma.hbm_to_vmem [thread:$0]  (!%p2858_p13), %s3196_s8, 256, %s392_s14, [#allocation11], %s2710_s19, %s2710_s19, %s2711_s30  }
  0x30   : > { %s2712_s25 = smov [#allocation4]   ;;  %s2713_s20 = smov [#allocation9]  }
  0x31   : > { %s354_s16 = sshll.u32 %s2712_s25, 4  ;;  %s381_s6 = sshll.u32 %s2713_s20, 4  ;;  %s355_s16 = int_to_ptr.vmem [resolvable:$true] %s354_s16  ;;  %s382_s6 = int_to_ptr.vmem [resolvable:$true] %s381_s6 }
  0x32   : > { %s2551_s21 = scalar_lea.vmem %s355_s16, 256  ;;  %p2559_p2 = scmp.lt.s32.totalorder %s355_s16, %s355_s16 }
  0x33   : > { %p2552_p9 = scmp.ne.s32.totalorder %s355_s16, %s2551_s21  ;;  %p2560_p5 = scmp.lt.s32.totalorder %s2551_s21, %s2551_s21 }
  0x35   : > { %p2554_p12 = pnand %p2552_p9, %p2864_p0  ;;  %p2561_p3 = por %p2560_p5, %p2559_p2 }
  0x37   : > { %p2555_p1 = pneg %p2554_p12 }
  0x39   : > { %p2562_p6 = pnand %p2561_p3, %p2555_p1 }
  0x3b   : > { %2565 = shalt.err (!%p2562_p6)
}
  0x3c   : > { %2359 = dma.hbm_to_vmem [thread:$0]  (!%p2858_p13), %s3193_s5, 256, %s355_s16, [#allocation5], %s2710_s19, %s2710_s19, %s2711_s30  }
  0x3d   : > { %s2577_s14 = scalar_lea.vmem %s382_s6, 16  ;;  %s2584_s21 = scalar_lea.vmem %s382_s6, 32 }
  0x3e   : > { %p2578_p7 = scmp.ne.s32.totalorder %s382_s6, %s2577_s14  ;;  %p2585_p2 = scmp.lt.s32.totalorder %s382_s6, %s382_s6 }
  0x3f   : > { %p2586_p1 = scmp.lt.s32.totalorder %s2584_s21, %s2577_s14 }
  0x40   : > { %p2580_p9 = pnand %p2578_p7, %p2864_p0 }
  0x41   : > { %p2587_p5 = por %p2586_p1, %p2585_p2 }
  0x42   : > { %p2581_p12 = pneg %p2580_p9 }
  0x44   : > { %p2588_p3 = pnand %p2587_p5, %p2581_p12 }
  0x46   : > { %2591 = shalt.err (!%p2588_p3)
}
  0x47   : > { %2365 = dma.hbm_to_vmem [thread:$0]  (!%p2858_p13), %s3195_s7, 16, %s382_s6, [#allocation8]  }
  0x48   : > { %s2714_s19 = smov [#allocation12]  }
  0x49   : > { %s405_s30 = sshll.u32 %s2714_s19, 4  ;;  %s406_s30 = int_to_ptr.vmem [resolvable:$true] %s405_s30 }
  0x4a   : > { %s2603_s16 = scalar_lea.vmem %s406_s30, 16  ;;  %s2610_s20 = scalar_lea.vmem %s406_s30, 32 }
  0x4b   : > { %p2604_p6 = scmp.ne.s32.totalorder %s406_s30, %s2603_s16  ;;  %p2611_p8 = scmp.lt.s32.totalorder %s406_s30, %s406_s30 }
  0x4c   : > { %p2612_p2 = scmp.lt.s32.totalorder %s2610_s20, %s2603_s16 }
  0x4d   : > { %p2606_p7 = pnand %p2604_p6, %p2864_p0 }
  0x4e   : > { %p2613_p12 = por %p2612_p2, %p2611_p8 }
  0x4f   : > { %p2607_p9 = pneg %p2606_p7 }
  0x51   : > { %p2614_p1 = pnand %p2613_p12, %p2607_p9 }
  0x53   : > { %2617 = shalt.err (!%p2614_p1)
}
  0x54   : > { %2371 = dma.hbm_to_vmem [thread:$0]  (!%p2858_p13), %s3197_s9, 16, %s406_s30, [#allocation11]  }
  0x55   : > { %431 = sbr.rel (%p2846_p10) target bundleno = 2086 (0x826), region = 68 }
  0x5a   : > { %2669 = dma.done.wait (%p2850_p11), [#allocation5], 256  }
  0x5b   : > { %2671 = vsyncadd (%p2850_p11), [#allocation5], 4294967040 }
  0x5c   : > { %2673 = dma.done.wait (%p2850_p11), [#allocation8], 272  }
  0x5d   : > { %2675 = vsyncadd (%p2850_p11), [#allocation8], 4294967024 }
  0x5e   : > { %2677 = dma.done.wait (%p2850_p11), [#allocation11], 272  }
  0x5f   : > { %2679 = vsyncadd (%p2850_p11), [#allocation11], 4294967024  ;;  %p488_p8 = scmp.lt.s32.totalorder %s2698_s24, 1  ;;  %vm500_vm0 = vcmask 261120   ;;  %v2452_v12 = vld [vmem:[%s3192_s4 + $0x8] sm:$0xff]   ;;  %v2715_v14 = vmov 0.0   ;;  %v516_v49 = vlaneseq }
  0x60   : > { %v2453_v13 = vld [vmem:[#allocation4 + $0x8] sm:$0xff]   ;;  %2234 = vmatprep.subr.bf16.mxu0 %v2715_v14  ;;  %2242 = vmatprep.subr.bf16.mxu1 %v2715_v14  ;;  %v2454_v15 = vld [vmem:[%s3192_s4] sm:$0xff]   ;;  %vm2716_vm1 = vmmov 0   ;;  %s2717_s28 = smov 112   ;;  %s2718_s27 = smov 120   ;;  %vm795_vm2 = vcmask 60416  }
  0x61   : > { %s489_s6 = scalar_select %p488_p8, %s2698_s24, 1  ;;  %2235 = vmatpush3.bf16.msra.mxu0 %v2452_v12  ;;  %2243 = vmatpush3.bf16.msra.mxu1 %v2453_v13  ;;  %v2455_v16 = vld [vmem:[#allocation4] sm:$0xff]   ;;  %v2456_v31 = vld [vmem:[%s3191_s3 + $0x8] sm:$0xff]   ;;  %v2720_v50 = vmov 1983009808   ;;  %v517_v54 = vshrl.u32 %v516_v49, 7 }
  0x62   : > { %2236 = vmatprep.subr.bf16.mxu0 %v2715_v14  ;;  %2244 = vmatprep.subr.bf16.mxu1 %v2715_v14  ;;  %v2196_v24 = vld [vmem:[%s3189_s1] ss:$0 sm:$0xff]  ;;  %v658_v51 = vunpack.c.l.s4 %v2720_v50  ;;  %v2721_v52 = vmov 1934713408   ;;  %vm1200_vm3 = vcmask 64512   ;;  %vm1432_vm4 = vcmask 1043456  }
  0x63   : > { %s2152_s17 = sshll.u32 %s489_s6, 3  ;;  %2238 = vmatprep.mubr.msk.bf16.mxu0 %vm2716_vm1, %v2715_v14  ;;  %2246 = vmatprep.mubr.msk.bf16.mxu1 %vm2716_vm1, %v2715_v14  ;;  %v2197_v26 = vld [vmem:[%s3190_s2] ss:$0 sm:$0xff]  ;;  %v690_v53 = vunpack.c.l.s4 %v2721_v52  ;;  %s2722_s18 = smov 16   ;;  %vm1771_vm5 = vcmask 130048   ;;  %vm1773_vm6 = vcmask 195584  }
  0x64   : > { %s491_s14 = scalar_lea.vmem %s3188_s0, %s2152_s17  ;;  %v2457_v34 = vld [vmem:[%s3191_s3] sm:$0xff]   ;;  %v659_v55 = vunpack.c.0.s8 %v658_v51  ;;  %s2723_s21 = smov 8   ;;  %vm1955_vm7 = vcmask 523264  }
  0x65   : > { %v2931_v0 = vld [vmem:[%s491_s14] sm:$0xff]  ;;  %2237 = vmatpush3.bf16.msra.mxu0 %v2454_v15  ;;  %2245 = vmatpush3.bf16.msra.mxu1 %v2455_v16  ;;  %s2719_s14 = smov 104   ;;  %v691_v57 = vunpack.c.0.s8 %v690_v53  ;;  %s2724_s29 = smov 24  }
  0x66   : > { %v501_v1 = vsel %vm500_vm0, %v2931_v0, 0.0  ;;  %2250 = vmatprep.subr.bf16.mxu0 %v2715_v14  ;;  %2258 = vmatprep.subr.bf16.mxu1 %v2715_v14  ;;  %v2983_v58 = vsub.s32 %v659_v55, %v517_v54  ;;  %s485_s17 = sand.u32 1, %s2690_s22   ;;  %s2725_s20 = smov [#allocation13]  }
  0x67   : > { %502 = vadd.xlane.f32.xlu0 %v501_v1  ;;  %s2622_s23 = sshll.u32 %s2725_s20, 4  ;;  %s2623_s23 = int_to_ptr.vmem [resolvable:$false] %s2622_s23 }
  0x68   : > { %s2624_s15 = scalar_lea.vmem %s2623_s23, 256 }
  0x6b   : > { %959 = vadd.xlane.f32.xlu0 %v501_v1 }
  0xf0   : > { %v503_v2 = vpop.xlane.xlu0 %502 }
  0xf1   : > { %v505_v3 = vmul.f32 0.03125, %v503_v2  ;;  %v2985_v2 = vsub.s32 %v691_v57, %v517_v54 }
  0xf3   : > { %v506_v4 = vsub.f32 %v2931_v0, %v505_v3 }
  0xf4   : > { %v960_v5 = vpop.xlane.xlu0 %959 }
  0xf5   : > { %v962_v6 = vmul.f32 0.03125, %v960_v5  ;;  %v507_v7 = vmul.f32 %v506_v4, %v506_v4 }
  0xf7   : > { %v963_v8 = vsub.f32 %v2931_v0, %v962_v6  ;;  %v508_v9 = vsel %vm500_vm0, %v507_v7, 0.0 }
  0xf8   : > { %509 = vadd.xlane.f32.xlu1 %v508_v9 }
  0xf9   : > { %v964_v10 = vmul.f32 %v963_v8, %v963_v8 }
  0xfb   : > { %v965_v11 = vsel %vm500_vm0, %v964_v10, 0.0 }
  0xfc   : > { %966 = vadd.xlane.f32.xlu1 %v965_v11 }
 0x181   : > { %v510_v17 = vpop.xlane.xlu1 %509 }
 0x182   : > { %v511_v18 = vmul.f32 0.03125, %v510_v17 }
 0x184   : > { %v512_v19 = vadd.f32 1e-05, %v511_v18 }
 0x185   : > { %v967_v20 = vpop.xlane.xlu1 %966 }
 0x186   : > { %2466 = vrsqrt.f32 %v512_v19  ;;  %v968_v21 = vmul.f32 0.03125, %v967_v20 }
 0x188   : > { %v969_v22 = vadd.f32 1e-05, %v968_v21 }
 0x18a   : > { %2468 = vrsqrt.f32 %v969_v22 }
 0x193   : > { %v2467_v23 = vpop.eup %2466 }
 0x194   : > { %v514_v25 = vmul.f32 %v2467_v23, %v506_v4 }
 0x196   : > { %v521_v27 = vmul.f32 %v2196_v24, %v514_v25 }
 0x197   : > { %v2469_v28 = vpop.eup %2468 }
 0x198   : > { %v528_v29 = vadd.f32 %v2197_v26, %v521_v27  ;;  %v971_v30 = vmul.f32 %v2469_v28, %v963_v8 }
 0x19a   : > { %v529_v32 = vpack.c.bf16 %v528_v29, %v528_v29  ;;  %v978_v33 = vmul.f32 %v2196_v24, %v971_v30 }
 0x19c   : > { %2239 = vmatmul.mubr.msk.bf16.vlgmr.msra.gmra.mxu0 %vm500_vm0, %v529_v32  ;;  %2247 = vmatmul.mubr.msk.bf16.vlgmr.msra.gmra.mxu1 %vm500_vm0, %v529_v32  ;;  %v985_v35 = vadd.f32 %v2197_v26, %v978_v33 }
 0x19d   : > { %2251 = vmatpush3.bf16.msra.mxu0 %v2456_v31  ;;  %2254 = vmatprep.mubr.msk.bf16.mxu0 %vm2716_vm1, %v2715_v14 }
 0x19e   : > { %2252 = vmatprep.subr.bf16.mxu0 %v2715_v14  ;;  %2260 = vmatprep.mubr.msk.bf16.mxu1 %vm2716_vm1, %v2715_v14  ;;  %v986_v36 = vpack.c.bf16 %v985_v35, %v985_v35 }
 0x1a1   : > { %2253 = vmatpush3.bf16.msra.mxu0 %v2457_v34 }
 0x1a2   : > { %2264 = vmatprep.subr.bf16.mxu0 %v2715_v14 }
 0x1a4   : > { %2255 = vmatmul.mubr.msk.bf16.vlgmr.msra.gmra.mxu0 %vm500_vm0, %v986_v36 }
 0x1a5   : > { %2266 = vmatprep.mubr.msk.bf16.mxu0 %vm2716_vm1, %v2715_v14 }
 0x25c   : > { %v583_v37 = vpop.f32.mrf.mxu0  ;;  %v2978_v38 = vpop.f32.mrf.mxu1 }
 0x25d   : > { %649 = vrot.lane.b32.xlu1 %v583_v37, %s2717_s28  ;;  %646 = vrot.lane.b32.xlu0 %v583_v37, %s2718_s27 }
 0x25e   : > { %v2240_v39 = vpop.f32.mrf.mxu0  ;;  %v2248_v40 = vpop.f32.mrf.mxu1 }
 0x260   : > { %v586_v41 = vpop.f32.mrf.mxu0  ;;  %v642_v42 = vpop.f32.mrf.mxu1 }
 0x261   : > { %652 = vrot.lane.b32.xlu1 %v583_v37, %s2719_s14 }
 0x262   : > { %v2241_v43 = vpop.f32.mrf.mxu0  ;;  %v2249_v44 = vpop.f32.mrf.mxu1 }
 0x264   : > { %v1040_v45 = vpop.f32.mrf.mxu0 }
 0x265   : > { %1050 = vrot.lane.b32.xlu0 %v1040_v45, %s2717_s28  ;;  %1047 = vrot.lane.b32.xlu1 %v1040_v45, %s2718_s27 }
 0x266   : > { %v2256_v46 = vpop.f32.mrf.mxu0 }
 0x268   : > { %v1043_v47 = vpop.f32.mrf.mxu0 }
 0x269   : > { %801 = vrot.lane.b32.xlu0 %v2978_v38, %s2718_s27  ;;  %1053 = vrot.lane.b32.xlu1 %v1040_v45, %s2719_s14 }
 0x26a   : > { %v2257_v48 = vpop.f32.mrf.mxu0 }
 0x26d   : > { %807 = vrot.lane.b32.xlu0 %v2978_v38, %s2719_s14  ;;  %804 = vrot.lane.b32.xlu1 %v2978_v38, %s2717_s28  ;;  %s2151_s28 = sshll.u32 %s485_s17, 3 }
 0x2cf   : > { %v650_v56 = vpop.permute.xlu1 %649  ;;  %v647_v61 = vpop.permute.xlu0 %646 }
 0x2d0   : > { %v655_v59 = vcombine.low %v583_v37, %v650_v56  ;;  %v656_v60 = vcombine.high %v583_v37, %v650_v56 }
 0x2d2   : > { %v663_v3 = vrot.slane %v655_v59, %v2983_v58  ;;  %v670_v4 = vrot.slane %v656_v60, %v2983_v58 }
 0x2d3   : > { %v653_v62 = vpop.permute.xlu1 %652 }
 0x2d4   : > { %v671_v63 = vcombine.low %v647_v61, %v653_v62  ;;  %v672_v1 = vcombine.high %v647_v61, %v653_v62 }
 0x2d6   : > { %v679_v5 = vrot.slane %v671_v63, %v2983_v58  ;;  %v686_v6 = vrot.slane %v672_v1, %v2983_v58 }
 0x2d7   : > { %v1048_v7 = vpop.permute.xlu1 %1047  ;;  %v1051_v12 = vpop.permute.xlu0 %1050 }
 0x2d8   : > { %v687_v8 = vcombine.low %v663_v3, %v679_v5  ;;  %v688_v9 = vcombine.high %v663_v3, %v679_v5  ;;  %v703_v10 = vcombine.low %v670_v4, %v686_v6  ;;  %v704_v11 = vcombine.high %v670_v4, %v686_v6 }
 0x2d9   : > { %v1056_v18 = vcombine.low %v1040_v45, %v1051_v12  ;;  %v1057_v19 = vcombine.high %v1040_v45, %v1051_v12 }
 0x2da   : > { %v695_v13 = vrot.slane %v687_v8, %v2985_v2  ;;  %v702_v15 = vrot.slane %v688_v9, %v2985_v2  ;;  %v711_v16 = vrot.slane %v703_v10, %v2985_v2  ;;  %v718_v17 = vrot.slane %v704_v11, %v2985_v2 }
 0x2db   : > { %v1054_v20 = vpop.permute.xlu1 %1053  ;;  %v1064_v31 = vrot.slane %v1056_v18, %v2983_v58  ;;  %v1071_v32 = vrot.slane %v1057_v19, %v2983_v58  ;;  %v802_v33 = vpop.permute.xlu0 %801 }
 0x2dc   : > { %v723_v21 = vcombine.low %v695_v13, %v702_v15  ;;  %v2159_v22 = vcombine.high %v695_v13, %v702_v15  ;;  %v739_v23 = vcombine.low %v711_v16, %v718_v17  ;;  %v2160_v24 = vcombine.high %v711_v16, %v718_v17 }
 0x2dd   : > { %v1072_v25 = vcombine.low %v1048_v7, %v1054_v20  ;;  %v1073_v26 = vcombine.high %v1048_v7, %v1054_v20 }
 0x2de   : > { %v730_v27 = vrot.slane %v723_v21, %v2983_v58  ;;  %v738_v28 = vrot.slane %v2159_v22, %v2983_v58  ;;  %v746_v29 = vrot.slane %v739_v23, %v2983_v58  ;;  %v754_v30 = vrot.slane %v2160_v24, %v2983_v58 }
 0x2df   : > { %v1080_v34 = vrot.slane %v1072_v25, %v2983_v58  ;;  %v1087_v35 = vrot.slane %v1073_v26, %v2983_v58  ;;  %v808_v62 = vpop.permute.xlu0 %807  ;;  %v805_v63 = vpop.permute.xlu1 %804 }
 0x2e0   : > { %v755_v36 = vcombine.low %v730_v27, %v738_v28  ;;  %v756_v37 = vcombine.high %v730_v27, %v738_v28  ;;  %v771_v39 = vcombine.low %v746_v29, %v754_v30  ;;  %v772_v40 = vcombine.high %v746_v29, %v754_v30 }
 0x2e1   : > { %v1088_v41 = vcombine.low %v1064_v31, %v1080_v34  ;;  %v1089_v42 = vcombine.high %v1064_v31, %v1080_v34  ;;  %v1104_v43 = vcombine.low %v1071_v32, %v1087_v35  ;;  %v1105_v44 = vcombine.high %v1071_v32, %v1087_v35 }
 0x2e2   : > { %v763_v45 = vrot.slane %v755_v36, %v2985_v2  ;;  %v770_v46 = vrot.slane %v756_v37, %v2985_v2  ;;  %v779_v47 = vrot.slane %v771_v39, %v2985_v2  ;;  %v786_v48 = vrot.slane %v772_v40, %v2985_v2 }
 0x2e3   : > { %v1096_v49 = vrot.slane %v1088_v41, %v2985_v2  ;;  %v1103_v50 = vrot.slane %v1089_v42, %v2985_v2  ;;  %v1112_v51 = vrot.slane %v1104_v43, %v2985_v2  ;;  %v1119_v52 = vrot.slane %v1105_v44, %v2985_v2 }
 0x2e4   : > { %v787_v53 = vcombine.low %v763_v45, %v779_v47  ;;  %v788_v54 = vcombine.high %v763_v45, %v779_v47  ;;  %v789_v55 = vcombine.low %v770_v46, %v786_v48  ;;  %v790_v56 = vcombine.high %v770_v46, %v786_v48 }
 0x2e5   : > { %v1124_v57 = vcombine.low %v1096_v49, %v1103_v50  ;;  %v2166_v59 = vcombine.high %v1096_v49, %v1103_v50  ;;  %v1140_v60 = vcombine.low %v1112_v51, %v1119_v52  ;;  %v2167_v61 = vcombine.high %v1112_v51, %v1119_v52 }
 0x2e6   : > { %v791_v1 = vpack.c.bf16 %v787_v53, %v787_v53  ;;  %v792_v3 = vpack.c.bf16 %v788_v54, %v788_v54  ;;  %v793_v4 = vpack.c.bf16 %v789_v55, %v789_v55  ;;  %v794_v5 = vpack.c.bf16 %v790_v56, %v790_v56 }
 0x2e7   : > { %v1131_v6 = vrot.slane %v1124_v57, %v2983_v58  ;;  %v1139_v7 = vrot.slane %v2166_v59, %v2983_v58  ;;  %v1147_v8 = vrot.slane %v1140_v60, %v2983_v58  ;;  %v1155_v9 = vrot.slane %v2167_v61, %v2983_v58 }
 0x2e8   : > { %796 = vst.msk [vmem:[#allocation2] sm:$0xf] %vm795_vm2, %v791_v1  ;;  %797 = vst.msk [vmem:[#allocation2 + $0x4] sm:$0xf] %vm795_vm2, %v792_v3  ;;  %v826_v10 = vcombine.low %v802_v33, %v808_v62  ;;  %v827_v11 = vcombine.high %v802_v33, %v808_v62  ;;  %v810_v12 = vcombine.low %v2978_v38, %v805_v63 }
 0x2e9   : > { %798 = vst.msk [vmem:[#allocation2 + $0x8] sm:$0xf] %vm795_vm2, %v793_v4  ;;  %799 = vst.msk [vmem:[#allocation2 + $0xc] sm:$0xf] %vm795_vm2, %v794_v5  ;;  %v811_v13 = vcombine.high %v2978_v38, %v805_v63  ;;  %v1156_v19 = vcombine.low %v1131_v6, %v1139_v7  ;;  %v1172_v20 = vcombine.low %v1147_v8, %v1155_v9 }
 0x2ea   : > { %v834_v15 = vrot.slane %v826_v10, %v2983_v58  ;;  %v841_v16 = vrot.slane %v827_v11, %v2983_v58  ;;  %v818_v17 = vrot.slane %v810_v12, %v2983_v58  ;;  %v1157_v36 = vcombine.high %v1131_v6, %v1139_v7 }
 0x2eb   : > { %v825_v18 = vrot.slane %v811_v13, %v2983_v58  ;;  %v1164_v30 = vrot.slane %v1156_v19, %v2985_v2  ;;  %v1180_v31 = vrot.slane %v1172_v20, %v2985_v2  ;;  %v1173_v44 = vcombine.high %v1147_v8, %v1155_v9 }
 0x2ec   : > { %v842_v21 = vcombine.low %v818_v17, %v834_v15  ;;  %v843_v22 = vcombine.high %v818_v17, %v834_v15  ;;  %v1171_v60 = vrot.slane %v1157_v36, %v2985_v2 }
 0x2ed   : > { %v858_v23 = vcombine.low %v825_v18, %v841_v16  ;;  %v859_v24 = vcombine.high %v825_v18, %v841_v16  ;;  %v1188_v45 = vcombine.low %v1164_v30, %v1180_v31  ;;  %v1189_v46 = vcombine.high %v1164_v30, %v1180_v31 }
 0x2ee   : > { %v850_v25 = vrot.slane %v842_v21, %v2985_v2  ;;  %v857_v26 = vrot.slane %v843_v22, %v2985_v2  ;;  %v1187_v61 = vrot.slane %v1173_v44, %v2985_v2 }
 0x2ef   : > { %v866_v38 = vrot.slane %v858_v23, %v2985_v2  ;;  %v873_v27 = vrot.slane %v859_v24, %v2985_v2  ;;  %v1196_v28 = vld [vmem:[#allocation2] sm:$0xf]  ;;  %v1197_v29 = vld [vmem:[#allocation2 + $0x4] sm:$0xf]  ;;  %v1192_v57 = vpack.c.bf16 %v1188_v45, %v1188_v45  ;;  %v1193_v59 = vpack.c.bf16 %v1189_v46, %v1189_v46 }
 0x2f0   : > { %v878_v32 = vcombine.low %v850_v25, %v857_v26  ;;  %v2161_v33 = vcombine.high %v850_v25, %v857_v26  ;;  %v1205_v37 = vsel %vm1200_vm3, %v1196_v28, 0  ;;  %v1251_v39 = vsel %vm1200_vm3, %v1197_v29, 0  ;;  %v1198_v55 = vld [vmem:[#allocation2 + $0x8] sm:$0xf]  ;;  %v1199_v56 = vld [vmem:[#allocation2 + $0xc] sm:$0xf] }
 0x2f1   : > { %v894_v34 = vcombine.low %v866_v38, %v873_v27  ;;  %v2162_v35 = vcombine.high %v866_v38, %v873_v27  ;;  %2259 = vmatpush3.bf16.xpose.msra.mxu1 %v1205_v37  ;;  %2265 = vmatpush3.bf16.xpose.msra.mxu0 %v1251_v39  ;;  %v1297_v4 = vsel %vm1200_vm3, %v1198_v55, 0  ;;  %v1343_v5 = vsel %vm1200_vm3, %v1199_v56, 0 }
 0x2f2   : > { %v885_v40 = vrot.slane %v878_v32, %v2983_v58  ;;  %v893_v41 = vrot.slane %v2161_v33, %v2983_v58  ;;  %2270 = vmatprep.subr.bf16.mxu1 %v2715_v14  ;;  %2276 = vmatprep.subr.bf16.mxu0 %v2715_v14  ;;  %v1190_v10 = vcombine.low %v1171_v60, %v1187_v61 }
 0x2f3   : > { %v901_v42 = vrot.slane %v894_v34, %v2983_v58  ;;  %v909_v43 = vrot.slane %v2162_v35, %v2983_v58  ;;  %v1191_v11 = vcombine.high %v1171_v60, %v1187_v61 }
 0x2f4   : > { %v910_v47 = vcombine.low %v885_v40, %v893_v41  ;;  %v911_v48 = vcombine.high %v885_v40, %v893_v41  ;;  %v1194_v12 = vpack.c.bf16 %v1190_v10, %v1190_v10 }
 0x2f5   : > { %v926_v49 = vcombine.low %v901_v42, %v909_v43  ;;  %v927_v50 = vcombine.high %v901_v42, %v909_v43  ;;  %v1195_v13 = vpack.c.bf16 %v1191_v11, %v1191_v11 }
 0x2f6   : > { %v918_v51 = vrot.slane %v910_v47, %v2985_v2  ;;  %v925_v52 = vrot.slane %v911_v48, %v2985_v2 }
 0x2f7   : > { %v934_v53 = vrot.slane %v926_v49, %v2985_v2  ;;  %v941_v54 = vrot.slane %v927_v50, %v2985_v2 }
 0x2f8   : > { %2261 = vmatmul.mubr.msk.bf16.vlgmr.msra.gmra.mxu1 %vm1200_vm3, %v1192_v57  ;;  %2267 = vmatmul.mubr.msk.bf16.vlgmr.msra.gmra.mxu0 %vm1200_vm3, %v1193_v59 }
 0x2f9   : > { %v942_v62 = vcombine.low %v918_v51, %v934_v53  ;;  %v943_v63 = vcombine.high %v918_v51, %v934_v53  ;;  %v944_v1 = vcombine.low %v925_v52, %v941_v54  ;;  %v945_v3 = vcombine.high %v925_v52, %v941_v54  ;;  %2271 = vmatpush3.bf16.xpose.msra.mxu1 %v1297_v4 }
 0x2fa   : > { %2277 = vmatpush3.bf16.xpose.msra.mxu0 %v1343_v5  ;;  %2272 = vmatprep.mubr.msk.bf16.mxu1 %vm2716_vm1, %v2715_v14 }
 0x2fb   : > { %v946_v6 = vpack.c.bf16 %v942_v62, %v942_v62  ;;  %v947_v7 = vpack.c.bf16 %v943_v63, %v943_v63  ;;  %v948_v8 = vpack.c.bf16 %v944_v1, %v944_v1  ;;  %v949_v9 = vpack.c.bf16 %v945_v3, %v945_v3  ;;  %2278 = vmatprep.mubr.msk.bf16.mxu0 %vm2716_vm1, %v2715_v14 }
 0x2fc   : > { %2282 = vmatprep.subr.bf16.mxu1 %v2715_v14  ;;  %2288 = vmatprep.subr.bf16.mxu0 %v2715_v14 }
 0x2fd   : > { %950 = vst.msk [vmem:[#allocation3] sm:$0xf] %vm795_vm2, %v946_v6  ;;  %951 = vst.msk [vmem:[#allocation3 + $0x4] sm:$0xf] %vm795_vm2, %v947_v7 }
 0x2fe   : > { %952 = vst.msk [vmem:[#allocation3 + $0x8] sm:$0xf] %vm795_vm2, %v948_v8  ;;  %953 = vst.msk [vmem:[#allocation3 + $0xc] sm:$0xf] %vm795_vm2, %v949_v9 }
 0x300   : > { %2273 = vmatmul.mubr.msk.bf16.vlgmr.msra.gmra.mxu1 %vm1200_vm3, %v1194_v12 }
 0x301   : > { %2279 = vmatmul.mubr.msk.bf16.vlgmr.msra.gmra.mxu0 %vm1200_vm3, %v1195_v13  ;;  %2284 = vmatprep.mubr.msk.bf16.mxu1 %vm2716_vm1, %v2715_v14 }
 0x302   : > { %2290 = vmatprep.mubr.msk.bf16.mxu0 %vm2716_vm1, %v2715_v14 }
 0x304   : > { %v1425_v15 = vld [vmem:[#allocation3] sm:$0xf]  ;;  %v1426_v16 = vld [vmem:[#allocation3 + $0x4] sm:$0xf] }
 0x305   : > { %v1434_v17 = vsel %vm1432_vm4, %v1425_v15, 0  ;;  %v1480_v18 = vsel %vm1432_vm4, %v1426_v16, 0  ;;  %v1427_v52 = vld [vmem:[#allocation3 + $0x8] sm:$0xf]  ;;  %v1428_v56 = vld [vmem:[#allocation3 + $0xc] sm:$0xf] }
 0x306   : > { %2283 = vmatpush3.bf16.msra.mxu1 %v1434_v17  ;;  %2289 = vmatpush3.bf16.msra.mxu0 %v1480_v18  ;;  %v1526_v60 = vsel %vm1432_vm4, %v1427_v52, 0  ;;  %v1572_v61 = vsel %vm1432_vm4, %v1428_v56, 0 }
 0x307   : > { %2294 = vmatprep.subr.bf16.mxu1 %v2715_v14  ;;  %2300 = vmatprep.subr.bf16.mxu0 %v2715_v14 }
 0x3b8   : > { %v1241_v19 = vpop.f32.mrf.mxu1  ;;  %v1287_v20 = vpop.f32.mrf.mxu0 }
 0x3b9   : > { %v1385_v21 = vsel %vm1200_vm3, %v1241_v19, -inf  ;;  %v1388_v23 = vsel %vm1200_vm3, %v1287_v20, -inf }
 0x3ba   : > { %1386 = vmax.xlane.f32.xlu1 %v1385_v21  ;;  %v2262_v22 = vpop.f32.mrf.mxu1  ;;  %1389 = vmax.xlane.f32.xlu0 %v1388_v23  ;;  %v2268_v24 = vpop.f32.mrf.mxu0 }
 0x3bc   : > { %v1244_v25 = vpop.f32.mrf.mxu1  ;;  %v1290_v26 = vpop.f32.mrf.mxu0 }
 0x3be   : > { %v2263_v38 = vpop.f32.mrf.mxu1  ;;  %v2269_v27 = vpop.f32.mrf.mxu0 }
 0x3c0   : > { %v1333_v28 = vpop.f32.mrf.mxu1 }
 0x3c1   : > { %v1379_v29 = vpop.f32.mrf.mxu0  ;;  %v1391_v30 = vsel %vm1200_vm3, %v1333_v28, -inf }
 0x3c2   : > { %v2274_v31 = vpop.f32.mrf.mxu1  ;;  %1392 = vmax.xlane.f32.xlu0 %v1391_v30  ;;  %v1394_v35 = vsel %vm1200_vm3, %v1379_v29, -inf }
 0x3c3   : > { %v2280_v32 = vpop.f32.mrf.mxu0 }
 0x3c4   : > { %v1336_v33 = vpop.f32.mrf.mxu1 }
 0x3c5   : > { %v1382_v34 = vpop.f32.mrf.mxu0 }
 0x3c6   : > { %v2275_v36 = vpop.f32.mrf.mxu1  ;;  %1395 = vmax.xlane.f32.xlu0 %v1394_v35 }
 0x3c7   : > { %v2281_v37 = vpop.f32.mrf.mxu0 }
 0x443   : > { %v1387_v39 = vpop.xlane.xlu1 %1386  ;;  %v1390_v41 = vpop.xlane.xlu0 %1389 }
 0x444   : > { %v1397_v40 = vsub.f32 %v1241_v19, %v1387_v39  ;;  %v1398_v42 = vsub.f32 %v1287_v20, %v1390_v41 }
 0x446   : > { %v1401_v43 = vmul.f32 1.442695, %v1397_v40  ;;  %v1403_v44 = vmul.f32 1.442695, %v1398_v42 }
 0x448   : > { %2470 = vpow2.f32 %v1401_v43 }
 0x449   : > { %2472 = vpow2.f32 %v1403_v44 }
 0x44b   : > { %v1393_v45 = vpop.xlane.xlu0 %1392 }
 0x44c   : > { %v1399_v46 = vsub.f32 %v1333_v28, %v1393_v45 }
 0x44e   : > { %v1405_v47 = vmul.f32 1.442695, %v1399_v46 }
 0x44f   : > { %v1396_v48 = vpop.xlane.xlu0 %1395 }
 0x450   : > { %2474 = vpow2.f32 %v1405_v47  ;;  %v1400_v49 = vsub.f32 %v1379_v29, %v1396_v48  ;;  %v2458_v47 = vld [vmem:[#allocation7 + $0x8] sm:$0xff]  }
 0x452   : > { %v1407_v50 = vmul.f32 1.442695, %v1400_v49 }
 0x454   : > { %2476 = vpow2.f32 %v1407_v50 }
 0x455   : > { %v2471_v51 = vpop.eup %2470 }
 0x456   : > { %v2473_v53 = vpop.eup %2472  ;;  %v1409_v54 = vsel %vm1200_vm3, %v2471_v51, 0.0  ;;  %v1421_v55 = vpack.c.bf16 %v2471_v51, %v2471_v51 }
 0x457   : > { %1410 = vadd.xlane.f32.xlu1 %v1409_v54  ;;  %v1412_v57 = vsel %vm1200_vm3, %v2473_v53, 0.0  ;;  %v1422_v59 = vpack.c.bf16 %v2473_v53, %v2473_v53 }
 0x458   : > { %1413 = vadd.xlane.f32.xlu0 %v1412_v57  ;;  %2285 = vmatmul.mubr.msk.bf16.vlgmr.msra.gmra.mxu1 %vm1200_vm3, %v1421_v55 }
 0x459   : > { %2291 = vmatmul.mubr.msk.bf16.vlgmr.msra.gmra.mxu0 %vm1200_vm3, %v1422_v59  ;;  %2295 = vmatpush3.bf16.msra.mxu1 %v1526_v60 }
 0x45a   : > { %2301 = vmatpush3.bf16.msra.mxu0 %v1572_v61  ;;  %2296 = vmatprep.mubr.msk.bf16.mxu1 %vm2716_vm1, %v2715_v14  ;;  %v2459_v61 = vld [vmem:[#allocation7] sm:$0xff]  }
 0x45b   : > { %2302 = vmatprep.mubr.msk.bf16.mxu0 %vm2716_vm1, %v2715_v14  ;;  %2306 = vmatprep.subr.bf16.mxu1 %v2715_v14 }
 0x45c   : > { %2314 = vmatprep.subr.bf16.mxu0 %v2715_v14 }
 0x45d   : > { %v2475_v62 = vpop.eup %2474 }
 0x45e   : > { %v1415_v63 = vsel %vm1200_vm3, %v2475_v62, 0.0  ;;  %v1423_v1 = vpack.c.bf16 %v2475_v62, %v2475_v62 }
 0x45f   : > { %1416 = vadd.xlane.f32.xlu1 %v1415_v63 }
 0x460   : > { %2297 = vmatmul.mubr.msk.bf16.vlgmr.msra.gmra.mxu1 %vm1200_vm3, %v1423_v1 }
 0x461   : > { %v2477_v3 = vpop.eup %2476  ;;  %2310 = vmatprep.mubr.msk.bf16.mxu1 %vm2716_vm1, %v2715_v14  ;;  %2307 = vmatpush3.bf16.msra.mxu1 %v2458_v47 }
 0x462   : > { %v1418_v4 = vsel %vm1200_vm3, %v2477_v3, 0.0  ;;  %v1424_v5 = vpack.c.bf16 %v2477_v3, %v2477_v3  ;;  %2308 = vmatprep.subr.bf16.mxu1 %v2715_v14 }
 0x463   : > { %1419 = vadd.xlane.f32.xlu0 %v1418_v4 }
 0x464   : > { %2303 = vmatmul.mubr.msk.bf16.vlgmr.msra.gmra.mxu0 %vm1200_vm3, %v1424_v5 }
 0x465   : > { %2318 = vmatprep.mubr.msk.bf16.mxu0 %vm2716_vm1, %v2715_v14  ;;  %2309 = vmatpush3.bf16.msra.mxu1 %v2459_v61 }
 0x466   : > { %2322 = vmatprep.subr.bf16.mxu1 %v2715_v14 }
 0x4e0   : > { %v1411_v6 = vpop.xlane.xlu1 %1410 }
 0x4e1   : > { %v1414_v7 = vpop.xlane.xlu0 %1413 }
 0x4e8   : > { %v1417_v8 = vpop.xlane.xlu1 %1416 }
 0x4e9   : > { %2478 = vrcp.f32 %v1417_v8 }
 0x4ea   : > { %2480 = vrcp.f32 %v1411_v6 }
 0x4eb   : > { %2482 = vrcp.f32 %v1414_v7 }
 0x4ec   : > { %v1420_v9 = vpop.xlane.xlu0 %1419 }
 0x4ed   : > { %2484 = vrcp.f32 %v1420_v9 }
 0x4f6   : > { %v2479_v19 = vpop.eup %2478 }
 0x4f7   : > { %v2481_v22 = vpop.eup %2480 }
 0x4f8   : > { %v2483_v24 = vpop.eup %2482 }
 0x4fa   : > { %v2485_v26 = vpop.eup %2484 }
 0x518   : > { %v1470_v10 = vpop.f32.mrf.mxu1 }
 0x519   : > { %v1516_v11 = vpop.f32.mrf.mxu0  ;;  %v1618_v25 = vmul.f32 %v2481_v22, %v1470_v10 }
 0x51a   : > { %v2286_v12 = vpop.f32.mrf.mxu1  ;;  %v1619_v28 = vmul.f32 %v2483_v24, %v1516_v11 }
 0x51b   : > { %v2292_v13 = vpop.f32.mrf.mxu0 }
 0x51c   : > { %v1473_v15 = vpop.f32.mrf.mxu1 }
 0x51d   : > { %v1519_v16 = vpop.f32.mrf.mxu0 }
 0x51e   : > { %v2287_v17 = vpop.f32.mrf.mxu1 }
 0x51f   : > { %v2293_v18 = vpop.f32.mrf.mxu0 }
 0x520   : > { %v1562_v20 = vpop.f32.mrf.mxu1  ;;  %v2460_v18 = vld [vmem:[#allocation10 + $0x8] sm:$0xff]  }
 0x521   : > { %v1620_v21 = vmul.f32 %v2479_v19, %v1562_v20  ;;  %2315 = vmatpush3.bf16.msra.mxu0 %v2460_v18  ;;  %v2461_v19 = vld [vmem:[#allocation10] sm:$0xff]   ;;  %v2178_v20 = vld [vmem:[#allocation9] ss:$0 sm:$0xff] }
 0x522   : > { %v2298_v23 = vpop.f32.mrf.mxu1  ;;  %2316 = vmatprep.subr.bf16.mxu0 %v2715_v14 }
 0x523   : > { %v1622_v29 = vcombine.low %v1618_v25, %v1620_v21  ;;  %v1623_v30 = vcombine.high %v1618_v25, %v1620_v21 }
 0x524   : > { %v1565_v38 = vpop.f32.mrf.mxu1  ;;  %v1608_v27 = vpop.f32.mrf.mxu0 }
 0x525   : > { %v1621_v31 = vmul.f32 %v2485_v26, %v1608_v27  ;;  %v1630_v37 = vrot.slane %v1622_v29, %v2983_v58  ;;  %v1637_v39 = vrot.slane %v1623_v30, %v2983_v58  ;;  %2317 = vmatpush3.bf16.msra.mxu0 %v2461_v19  ;;  %v2462_v27 = vld [vmem:[%s3198_s10 + $0x18] sm:$0xff]   ;;  %v2465_v29 = vld [vmem:[%s3198_s10] sm:$0xff]   ;;  %v2182_v30 = vld [vmem:[#allocation12] ss:$0 sm:$0xff] }
 0x526   : > { %v2299_v32 = vpop.f32.mrf.mxu1  ;;  %v2304_v33 = vpop.f32.mrf.mxu0 }
 0x527   : > { %v1638_v34 = vcombine.low %v1619_v28, %v1621_v31  ;;  %v1639_v35 = vcombine.high %v1619_v28, %v1621_v31  ;;  %v2463_v28 = vld [vmem:[%s3198_s10 + $0x10] sm:$0xff]  }
 0x528   : > { %v1611_v36 = vpop.f32.mrf.mxu0 }
 0x529   : > { %v1646_v40 = vrot.slane %v1638_v34, %v2983_v58  ;;  %v1653_v41 = vrot.slane %v1639_v35, %v2983_v58 }
 0x52a   : > { %v2305_v42 = vpop.f32.mrf.mxu0 }
 0x52b   : > { %v1654_v43 = vcombine.low %v1630_v37, %v1646_v40  ;;  %v1655_v44 = vcombine.high %v1630_v37, %v1646_v40  ;;  %v1670_v45 = vcombine.low %v1637_v39, %v1653_v41  ;;  %v1671_v46 = vcombine.high %v1637_v39, %v1653_v41 }
 0x52d   : > { %v1662_v48 = vrot.slane %v1654_v43, %v2985_v2  ;;  %v1669_v49 = vrot.slane %v1655_v44, %v2985_v2  ;;  %v1678_v50 = vrot.slane %v1670_v45, %v2985_v2  ;;  %v1685_v51 = vrot.slane %v1671_v46, %v2985_v2 }
 0x52f   : > { %v1690_v52 = vcombine.low %v1662_v48, %v1669_v49  ;;  %v2176_v53 = vcombine.high %v1662_v48, %v1669_v49  ;;  %v1706_v54 = vcombine.low %v1678_v50, %v1685_v51  ;;  %v2177_v55 = vcombine.high %v1678_v50, %v1685_v51 }
 0x531   : > { %v1697_v56 = vrot.slane %v1690_v52, %v2983_v58  ;;  %v1705_v57 = vrot.slane %v2176_v53, %v2983_v58  ;;  %v1713_v59 = vrot.slane %v1706_v54, %v2983_v58  ;;  %v1721_v60 = vrot.slane %v2177_v55, %v2983_v58 }
 0x533   : > { %v1723_v62 = vcombine.high %v1697_v56, %v1705_v57  ;;  %v1739_v63 = vcombine.high %v1713_v59, %v1721_v60  ;;  %v1722_v1 = vcombine.low %v1697_v56, %v1705_v57  ;;  %v1738_v3 = vcombine.low %v1713_v59, %v1721_v60 }
 0x535   : > { %v1737_v4 = vrot.slane %v1723_v62, %v2985_v2  ;;  %v1753_v5 = vrot.slane %v1739_v63, %v2985_v2  ;;  %v1730_v6 = vrot.slane %v1722_v1, %v2985_v2  ;;  %v1746_v7 = vrot.slane %v1738_v3, %v2985_v2 }
 0x537   : > { %v1756_v8 = vcombine.low %v1737_v4, %v1753_v5  ;;  %v1755_v9 = vcombine.high %v1730_v6, %v1746_v7  ;;  %v1754_v10 = vcombine.low %v1730_v6, %v1746_v7  ;;  %v1757_v58 = vcombine.high %v1737_v4, %v1753_v5 }
 0x539   : > { %1763 = vrot.lane.b32.xlu0 %v1756_v8, %s2722_s18  ;;  %1759 = vrot.lane.b32.xlu1 %v1755_v9, %s2723_s21  ;;  %s2193_s18 = sshll.u32 %s2698_s24, 7  ;;  %s487_s21 = scalar_lea.vmem [#allocation13], %s2151_s28 }
 0x53a   : > { %s3141_s30 = scalar_lea.hbm %s3200_s12, %s2193_s18  ;;  %s2002_s24 = scalar_lea.sflag [#allocation6], %s485_s17 }
 0x53d   : > { %1767 = vrot.lane.b32.xlu1 %v1757_v58, %s2724_s29  ;;  %s2016_s29 = sshll.u32 %s487_s21, 4  ;;  %s3143_s29 = int_to_ptr.vmem [resolvable:$true] %s2016_s29 }
 0x53e   : > { %s2618_s16 = scalar_lea.vmem %s3143_s29, 128  ;;  %p2625_p0 = scmp.lt.s32.totalorder %s3143_s29, %s2623_s23 }
 0x53f   : > { %p2619_p10 = scmp.ne.s32.totalorder %s3143_s29, %s2618_s16  ;;  %p2626_p5 = scmp.lt.s32.totalorder %s2624_s15, %s2618_s16 }
 0x541   : > { %p2620_p11 = pnand %p2619_p10, %p2831_p4  ;;  %p2627_p3 = por %p2626_p5, %p2625_p0 }
 0x543   : > { %p2621_p13 = pneg %p2620_p11 }
 0x545   : > { %p2628_p6 = pnand %p2627_p3, %p2621_p13 }
 0x5ab   : > { %v1760_v11 = vpop.permute.xlu1 %1759  ;;  %v1764_v12 = vpop.permute.xlu0 %1763 }
 0x5ac   : > { %v1770_v13 = vsel %vm1200_vm3, %v1754_v10, %v1760_v11 }
 0x5ad   : > { %v1772_v16 = vsel %vm1771_vm5, %v1770_v13, %v1764_v12 }
 0x5af   : > { %v1768_v15 = vpop.permute.xlu1 %1767 }
 0x5b0   : > { %v1774_v17 = vsel %vm1773_vm6, %v1772_v16, %v1768_v15 }
 0x5b1   : > { %v1775_v2 = vpack.c.bf16 %v1774_v17, %v1774_v17 }
 0x5b3   : > { %2311 = vmatmul.mubr.msk.bf16.vlgmr.msra.gmra.mxu1 %vm500_vm0, %v1775_v2 }
 0x5b4   : > { %2330 = vmatprep.mubr.msk.bf16.mxu1 %vm2716_vm1, %v2715_v14  ;;  %2323 = vmatpush3.bf16.msra.mxu1 %v2462_v27 }
 0x5b5   : > { %2324 = vmatprep.subr.bf16.mxu1 %v2715_v14 }
 0x5b8   : > { %2325 = vmatpush3.bf16.msra.mxu1 %v2463_v28 }
 0x5b9   : > { %2326 = vmatprep.subr.bf16.mxu1 %v2715_v14 }
 0x673   : > { %v1836_v21 = vpop.f32.mrf.mxu1 }
 0x674   : > { %v1837_v22 = vadd.f32 %v2178_v20, %v1836_v21 }
 0x675   : > { %v2312_v23 = vpop.f32.mrf.mxu1 }
 0x676   : > { %v1842_v24 = vadd.f32 %v1837_v22, %v2931_v0  ;;  %v2464_v0 = vld [vmem:[%s3198_s10 + $0x8] sm:$0xff]  }
 0x677   : > { %v1839_v25 = vpop.f32.mrf.mxu1  ;;  %2327 = vmatpush3.bf16.msra.mxu1 %v2464_v0 }
 0x678   : > { %v1843_v26 = vpack.c.bf16 %v1842_v24, %v1842_v24  ;;  %2328 = vmatprep.subr.bf16.mxu1 %v2715_v14  ;;  %v2186_v14 = vld [vmem:[%s3199_s11] ss:$0 sm:$0xff] }
 0x679   : > { %v2313_v38 = vpop.f32.mrf.mxu1 }
 0x67a   : > { %2319 = vmatmul.mubr.msk.bf16.vlgmr.msra.gmra.mxu0 %vm500_vm0, %v1843_v26 }
 0x67b   : > { %2329 = vmatpush3.bf16.msra.mxu1 %v2465_v29 }
 0x73a   : > { %v1904_v31 = vpop.f32.mrf.mxu0 }
 0x73b   : > { %v1905_v32 = vadd.f32 %v2182_v30, %v1904_v31 }
 0x73c   : > { %v2320_v33 = vpop.f32.mrf.mxu0 }
 0x73d   : > { %v1911_v34 = vmul.f32 0.70710677, %v1905_v32  ;;  %v1910_v39 = vmul.f32 0.5, %v1905_v32 }
 0x73e   : > { %v1907_v35 = vpop.f32.mrf.mxu0 }
 0x73f   : > { %2486 = verf.f32 %v1911_v34 }
 0x740   : > { %v2321_v36 = vpop.f32.mrf.mxu0 }
 0x74c   : > { %v2487_v37 = vpop.eup %2486 }
 0x74d   : > { %v1913_v40 = vadd.f32 1.0, %v2487_v37 }
 0x74f   : > { %v1914_v41 = vmul.f32 %v1913_v40, %v1910_v39 }
 0x751   : > { %v1915_v42 = vpack.c.bf16 %v1914_v41, %v1914_v41 }
 0x753   : > { %2331 = vmatmul.mubr.msk.bf16.vlgmr.msra.gmra.mxu1 %vm1955_vm7, %v1915_v42 }
 0x813   : > { %v1993_v43 = vpop.f32.mrf.mxu1 }
 0x814   : > { %v1994_v44 = vadd.f32 %v2186_v14, %v1993_v43 }
 0x815   : > { %v2332_v45 = vpop.f32.mrf.mxu1 }
 0x816   : > { %v1999_v46 = vadd.f32 %v1994_v44, %v1842_v24 }
 0x817   : > { %v1996_v47 = vpop.f32.mrf.mxu1 }
 0x818   : > { %2000 = vst.msk [vmem:[%s487_s21] sm:$0xff] %vm500_vm0, %v1999_v46 }
 0x819   : > { %v2333_v48 = vpop.f32.mrf.mxu1 }
 0x81a   : > { %2631 = shalt.err (!%p2628_p6)
}
 0x81b   : > { %s2632_s6 = scalar_lea.hbm %s3141_s30, 128  ;;  %s2636_s27 = scalar_lea.hbm %s3200_s12, 256 }
 0x81c   : > { %p2633_p7 = scmp.ne.s32.totalorder %s3141_s30, %s2632_s6  ;;  %p2637_p12 = scmp.lt.s32.totalorder %s3141_s30, %s3200_s12 }
 0x81d   : > { %p2638_p1 = scmp.lt.s32.totalorder %s2636_s27, %s2632_s6 }
 0x81e   : > { %p2634_p9 = pnand %p2633_p7, %p2831_p4 }
 0x81f   : > { %p2639_p8 = por %p2638_p1, %p2637_p12 }
 0x820   : > { %p2635_p2 = pneg %p2634_p9 }
 0x822   : > { %p2640_p10 = pnand %p2639_p8, %p2635_p2 }
 0x824   : > { %2643 = shalt.err (!%p2640_p10)
}
 0x825   : > { %2354 = dma.vmem_to_hbm [thread:$0]  (%p2831_p4), %s3143_s29, 128, %s3141_s30, %s2002_s24  }
 0x826 PF: > { %s3220_s21 = sld [smem:[#allocation18_spill]]  ;;  %p2386_p11 = scmp.ge.s32.totalorder %s2706_s26, 2 }
 0x827   : > { %s3221_s25 = sld [smem:[#allocation22_spill]] }
 0x82c   : > { %s2028_s19 = sand.u32 1, %s3220_s21  }
 0x82d   : > { %p3222_p13 = scmp.ne.s32.totalorder %s3221_s25, 0  ;;  %s2029_s16 = scalar_lea.sflag [#allocation6], %s2028_s19 }
 0x82f   : > { %p2373_p0 = pnand %p2386_p11, %p3222_p13 }
 0x831   : > { %p2374_p5 = pneg %p2373_p0 }
 0x833   : > { %2681 = dma.done.wait (%p2374_p5), %s2029_s16, 128  }
 0x834   : > { %2683 = vsyncadd (%p2374_p5), %s2029_s16, 4294967168  ;;  %s28_s26 = sadd.s32 1, %s2706_s26   ;;  %s3223_s13 = sld [smem:[#allocation19_spill]] }
 0x835   : > { %p25_p3 = scmp.ge.s32.totalorder %s28_s26, 4   ;;  %s3224_s23 = sld [smem:[#allocation23_spill]] }
 0x836   : > { %s3225_s24 = sld [smem:[#allocation20_spill]]  ;;  %s3227_s21 = smov %s2690_s22 }
 0x837   : > { %s3226_s25 = sld [smem:[#allocation21_spill]]  ;;  %27 = sbr.rel (!%p25_p3) target bundleno = 9 (0x9), region = 129 }
 0x83a   : > { %s3228_s22 = smov %s3223_s13 }
 0x83c   :  { %2034 = vsyncpa [#allocation5], 1 }
 0x83d   :  { %2036 = vsyncpa [#allocation5 + $0x1], 1 }
 0x83e   :  { %2037 = vsyncpa [#allocation8], 1 }
 0x83f   :  { %2038 = vsyncpa [#allocation11], 1 }
 0x840   :  { %2039 = vsyncpa [#allocation6], 1 }
 0x841   :  { %2041 = vsyncpa [#allocation6 + $0x1], 1 }

</bundles_post_ra>
